<compile_context>
chip_gen: v6e
topology: v6e:2x2x1
jax: 0.10.0
libtpu: 0.0.40
codegen_flags: <defaults>
</compile_context>

<pallas_src>
import functools

import jax
import jax.numpy as jnp
from jax.experimental import pallas as pl
from jax.experimental.pallas import tpu as pltpu

EPS = 1e-5


def _round_up(v, m):
    return (v + m - 1) // m * m


# ---------------------------------------------------------------------------
# Pass 1: fused maxpool(2) + 3x3 conv (9 accumulating bf16 MXU matmuls) + bias
#         + per-image partial BN statistics.  One grid step per batch image.
# ---------------------------------------------------------------------------
def _pool_conv_stats_kernel(x_ref, w_ref, b_ref, y_ref, stats_ref, flat_ref,
                            *, hp, wp, cin, S):
    mp = hp * S                          # rows of the width-extended output

    # ---- fused 2x2 max-pool via static slicing of 2x2-grouped windows ------
    xg = x_ref[...]                      # (hp, 2, wp, 2*cin), bf16
    pooled = jnp.maximum(
        jnp.maximum(xg[:, 0, :, :cin], xg[:, 0, :, cin:]),
        jnp.maximum(xg[:, 1, :, :cin], xg[:, 1, :, cin:]))   # (hp, wp, cin)

    # ---- zero-padded pooled image as a flat (rows, cin) bf16 matrix --------
    # Row stride S (multiple of 16) makes each conv tap below one contiguous,
    # mostly sublane-aligned row-slice.  Re-zeroed every step on purpose: the
    # batch grid axis is "parallel" (megacore), so a core whose shard starts at
    # i > 0 must not depend on a program_id==0-only init.
    flat_ref[...] = jnp.zeros_like(flat_ref)
    # TODO(synk): switch to lax.fori_loop / one padded block store when hp is
    # large; static unroll is fine at these sizes.
    for h in range(hp):
        flat_ref[pl.ds((h + 1) * S + 1, wp), :] = pooled[h]

    # ---- 3x3 conv == 9 accumulating MXU matmuls (bf16 in, f32 accumulate) --
    acc = None
    for k in range(9):
        ky, kx = divmod(k, 3)
        taps = flat_ref[pl.ds(ky * S + kx, mp), :]            # (mp, cin) bf16
        part = jnp.dot(taps, w_ref[k], preferred_element_type=jnp.float32)
        acc = part if acc is None else acc + part
    acc = acc + b_ref[...]                                    # (mp, cout_p) f32

    # ---- per-image partial BN statistics (mask off width-pad rows) ---------
    r = jax.lax.broadcasted_iota(jnp.int32, (mp, 1), 0)
    valid = (r % S) < wp                                      # in-kernel mask
    ym = jnp.where(valid, acc, 0.0)
    stats_ref[0, 0:1, :] = jnp.sum(ym, axis=0, keepdims=True)
    stats_ref[0, 1:2, :] = jnp.sum(ym * ym, axis=0, keepdims=True)

    # ---- bf16, lane-dense (Cout padded to 128) pre-BN activations ----------
    y_ref[0] = acc.astype(jnp.bfloat16)


# ---------------------------------------------------------------------------
# Pass 2: folded BatchNorm affine + ReLU; drops the width-pad columns in-kernel
#         and writes lane-dense (Cout padded to 128) f32 output.
# ---------------------------------------------------------------------------
def _bn_relu_kernel(y_ref, scale_ref, shift_ref, o_ref, *, wp):
    y = y_ref[0].astype(jnp.float32)                          # (hp, S, cout_p)
    z = jnp.maximum(y * scale_ref[...] + shift_ref[...], 0.0)
    o_ref[0] = z[:, :wp, :]                                   # drop width pad


# ---------------------------------------------------------------------------
# Forward pass (mirrors Down.forward; accepts / returns NCHW like PyTorch)
# ---------------------------------------------------------------------------
def down_forward(params, x_nchw):
    w, b, gamma, beta = params                                # w: (3,3,Cin,Cout)
    n, cin, h, wdt = x_nchw.shape
    assert h % 2 == 0 and wdt % 2 == 0, "max_pool2d(2) needs even H, W"
    hp, wp = h // 2, wdt // 2
    cout = w.shape[-1]
    cout_p = _round_up(cout, 128)        # lane-dense matmul N / y / pass-2
    S = _round_up(wp + 2, 16)            # sublane-aligned padded row stride
    mp = hp * S
    flat_rows = (hp + 2) * S + 16

    # NCHW -> NHWC, bf16, and group the 2x2 pooling windows with a contiguous
    # reshape: (n, 2hp, 2wp, cin) -> (n*hp, 2, wp, 2*cin).
    # TODO(synk): for small Cin, repack so the input lane axis is >=128 wide.
    x = jnp.transpose(x_nchw, (0, 2, 3, 1)).astype(jnp.bfloat16)
    xg = x.reshape(n * hp, 2, wp, 2 * cin)

    w9 = jnp.pad(w.reshape(9, cin, cout),
                 ((0, 0), (0, 0), (0, cout_p - cout))).astype(jnp.bfloat16)
    b2 = jnp.pad(b, (0, cout_p - cout)).reshape(1, cout_p).astype(jnp.float32)

    kern1 = functools.partial(_pool_conv_stats_kernel,
                              hp=hp, wp=wp, cin=cin, S=S)
    flops1 = 2 * n * mp * cin * cout_p * 9
    bytes1 = (2 * (xg.size + w9.size + n * mp * cout_p)
              + 4 * (b2.size + n * 2 * cout_p))

    # TODO(synk): row-tile the per-image block (1-row halo, grid=(n, hp//TH))
    # for very large spatial inputs so the whole pooled image need not be
    # VMEM-resident (v7x 64 MiB); not needed at these shapes.
    y, stats = pl.pallas_call(
        kern1,
        out_shape=(jax.ShapeDtypeStruct((n, mp, cout_p), jnp.bfloat16),
                   jax.ShapeDtypeStruct((n, 2, cout_p), jnp.float32)),
        grid_spec=pltpu.PrefetchScalarGridSpec(
            num_scalar_prefetch=0,
            grid=(n,),
            in_specs=[
                pl.BlockSpec((hp, 2, wp, 2 * cin), lambda i: (i, 0, 0, 0)),
                pl.BlockSpec((9, cin, cout_p), lambda i: (0, 0, 0)),
                pl.BlockSpec((1, cout_p), lambda i: (0, 0)),
            ],
            out_specs=(
                pl.BlockSpec((1, mp, cout_p), lambda i: (i, 0, 0)),
                pl.BlockSpec((1, 2, cout_p), lambda i: (i, 0, 0)),
            ),
            scratch_shapes=[
                pltpu.VMEM((flat_rows, cin), jnp.bfloat16),   # padded pooled img
            ]),
        compiler_params=pltpu.CompilerParams(
            dimension_semantics=("parallel",),
            vmem_limit_bytes=48 * 1024 * 1024),
        cost_estimate=pl.CostEstimate(flops=flops1, transcendentals=0,
                                      bytes_accessed=bytes1),
    )(xg, w9, b2)

    # ---- fold training-mode BN (biased variance, f32, O(C) glue) ------------
    cnt = float(n * hp * wp)
    tot = jnp.sum(stats, axis=0)                              # (2, cout_p)
    mean = tot[0] / cnt
    var = jnp.maximum(tot[1] / cnt - mean * mean, 0.0)
    inv = jax.lax.rsqrt(var + EPS)
    gamma_p = jnp.pad(gamma, (0, cout_p - cout), constant_values=1.0)
    beta_p = jnp.pad(beta, (0, cout_p - cout))
    scale = (gamma_p * inv).reshape(1, cout_p)
    shift = (beta_p - mean * gamma_p * inv).reshape(1, cout_p)

    # Layout-compatible split of the row axis (S is a sublane multiple), so the
    # pass-2 kernel needs no in-kernel reshape.
    y4 = y.reshape(n, hp, S, cout_p)

    kern2 = functools.partial(_bn_relu_kernel, wp=wp)
    out_p = pl.pallas_call(
        kern2,
        out_shape=jax.ShapeDtypeStruct((n, hp, wp, cout_p), jnp.float32),
        grid_spec=pltpu.PrefetchScalarGridSpec(
            num_scalar_prefetch=0,
            grid=(n,),
            in_specs=[
                pl.BlockSpec((1, hp, S, cout_p), lambda i: (i, 0, 0, 0)),
                pl.BlockSpec((1, cout_p), lambda i: (0, 0)),
                pl.BlockSpec((1, cout_p), lambda i: (0, 0)),
            ],
            out_specs=pl.BlockSpec((1, hp, wp, cout_p),
                                   lambda i: (i, 0, 0, 0))),
        compiler_params=pltpu.CompilerParams(
            dimension_semantics=("parallel",),
            vmem_limit_bytes=48 * 1024 * 1024),
        cost_estimate=pl.CostEstimate(
            flops=3 * n * mp * cout_p, transcendentals=0,
            bytes_accessed=2 * n * mp * cout_p + 4 * n * hp * wp * cout_p),
    )(y4, scale, shift)

    # Drop the Cout zero-pad and convert to the module's NCHW layout (small
    # final tensor; the transpose is API-mandated).
    return jnp.transpose(out_p[..., :cout], (0, 3, 1, 2))


# ---------------------------------------------------------------------------
# Parameter init (deterministic, synthetic; matches nn.Conv2d default bounds)
# ---------------------------------------------------------------------------
def init_down_params(key, channel_in, channel_out):
    kw, kb = jax.random.split(key)
    fan_in = channel_in * 9
    bound = 1.0 / (fan_in ** 0.5)
    w = jax.random.uniform(kw, (3, 3, channel_in, channel_out), jnp.float32,
                           -bound, bound)
    b = jax.random.uniform(kb, (channel_out,), jnp.float32, -bound, bound)
    gamma = jnp.ones((channel_out,), jnp.float32)     # BN weight
    beta = jnp.zeros((channel_out,), jnp.float32)     # BN bias
    return w, b, gamma, beta


# ---------------------------------------------------------------------------
# Pure-JAX reference (f32) for a correctness check
# ---------------------------------------------------------------------------
def reference_forward(params, x_nchw):
    w, b, gamma, beta = params
    x = jnp.transpose(x_nchw, (0, 2, 3, 1)).astype(jnp.float32)
    n, h, wdt, cin = x.shape
    pooled = x.reshape(n, h // 2, 2, wdt // 2, 2, cin).max(axis=(2, 4))
    y = jax.lax.conv_general_dilated(
        pooled, w, window_strides=(1, 1), padding="SAME",
        dimension_numbers=("NHWC", "HWIO", "NHWC"))
    y = y + b
    mean = y.mean(axis=(0, 1, 2))
    var = y.var(axis=(0, 1, 2))                       # biased (training mode)
    yn = (y - mean) * jax.lax.rsqrt(var + EPS) * gamma + beta
    out = jnp.maximum(yn, 0.0)
    return jnp.transpose(out, (0, 3, 1, 2))


# ---------------------------------------------------------------------------
if __name__ == "__main__":
    key = jax.random.PRNGKey(0)
    kp, kx = jax.random.split(key)

    channel_in, channel_out = 4, 8
    params = init_down_params(kp, channel_in, channel_out)
    x = jax.random.normal(kx, (2, channel_in, 16, 16), jnp.float32)

    fwd = jax.jit(functools.partial(down_forward, params))
    out = jax.block_until_ready(fwd(x))

    assert out.shape == (2, channel_out, 8, 8)
    assert bool(jnp.all(jnp.isfinite(out)))
    assert bool(jnp.all(out >= 0.0))                  # ReLU output

    ref = reference_forward(params, x)
    max_err = float(jnp.max(jnp.abs(out - ref)))
    # bf16 MXU operands / bf16 inter-pass activation vs f32 reference.
    assert bool(jnp.allclose(out, ref, atol=5e-2, rtol=5e-2)), max_err

    print("KERNEL_OK")
</pallas_src>

<mosaic_0001>
module attributes {stable_mosaic.version = 11 : i64} {
  func.func @_pool_conv_stats_kernel(%arg0: i32, %arg1: memref<8x2x8x8xbf16, #tpu.memory_space<vmem>>, %arg2: memref<9x4x128xbf16, #tpu.memory_space<vmem>>, %arg3: memref<1x128xf32, #tpu.memory_space<vmem>>, %arg4: memref<1x128x128xbf16, #tpu.memory_space<vmem>>, %arg5: memref<1x2x128xf32, #tpu.memory_space<vmem>>, %arg6: memref<176x4xbf16, #tpu.memory_space<vmem>>) attributes {dimension_semantics = [#tpu.dimension_semantics<parallel>], iteration_bounds = array<i64: 2>, scalar_prefetch = 0 : i64, scratch_operands = 1 : i64, tpu.core_type = #tpu.core_type<tc>, window_params = [{transform_indices = @transform_0, window_bounds = array<i64: 8, 2, 8, 8>}, {pipeline_mode = #tpu.pipeline_mode<synchronous>, transform_indices = @transform_1, window_bounds = array<i64: 9, 4, 128>}, {pipeline_mode = #tpu.pipeline_mode<synchronous>, transform_indices = @transform_2, window_bounds = array<i64: 1, 128>}, {transform_indices = @transform_3, window_bounds = array<i64: 1, 128, 128>}, {transform_indices = @transform_4, window_bounds = array<i64: 1, 2, 128>}]} {
    %c0 = arith.constant 0 : index
    %c0_0 = arith.constant 0 : index
    %c0_1 = arith.constant 0 : index
    %c0_2 = arith.constant 0 : index
    %0 = vector.load %arg1[%c0, %c0_0, %c0_1, %c0_2] : memref<8x2x8x8xbf16, #tpu.memory_space<vmem>>, vector<8x2x8x8xbf16>
    %1 = vector.extract_strided_slice %0 {offsets = [0, 0, 0, 0], sizes = [8, 1, 8, 4], strides = [1, 1, 1, 1]} : vector<8x2x8x8xbf16> to vector<8x1x8x4xbf16>
    %2 = vector.shape_cast %1 : vector<8x1x8x4xbf16> to vector<8x8x4xbf16>
    %3 = vector.extract_strided_slice %0 {offsets = [0, 0, 0, 4], sizes = [8, 1, 8, 4], strides = [1, 1, 1, 1]} : vector<8x2x8x8xbf16> to vector<8x1x8x4xbf16>
    %4 = vector.shape_cast %3 : vector<8x1x8x4xbf16> to vector<8x8x4xbf16>
    %5 = arith.maximumf %2, %4 : vector<8x8x4xbf16>
    %6 = vector.extract_strided_slice %0 {offsets = [0, 1, 0, 0], sizes = [8, 1, 8, 4], strides = [1, 1, 1, 1]} : vector<8x2x8x8xbf16> to vector<8x1x8x4xbf16>
    %7 = vector.shape_cast %6 : vector<8x1x8x4xbf16> to vector<8x8x4xbf16>
    %8 = vector.extract_strided_slice %0 {offsets = [0, 1, 0, 4], sizes = [8, 1, 8, 4], strides = [1, 1, 1, 1]} : vector<8x2x8x8xbf16> to vector<8x1x8x4xbf16>
    %9 = vector.shape_cast %8 : vector<8x1x8x4xbf16> to vector<8x8x4xbf16>
    %10 = arith.maximumf %7, %9 : vector<8x8x4xbf16>
    %11 = arith.maximumf %5, %10 : vector<8x8x4xbf16>
    %cst = arith.constant 0.000000e+00 : bf16
    %12 = vector.broadcast %cst : bf16 to vector<176x4xbf16>
    %c0_3 = arith.constant 0 : index
    %c0_4 = arith.constant 0 : index
    %13 = vector.load %arg6[%c0_3, %c0_4] : memref<176x4xbf16, #tpu.memory_space<vmem>>, vector<176x4xbf16>
    tpu.vector_store %arg6[%c0_3, %c0_4], %12 {strides = array<i32>} : memref<176x4xbf16, #tpu.memory_space<vmem>>, vector<176x4xbf16>,
    %14 = vector.extract_strided_slice %11 {offsets = [0, 0, 0], sizes = [1, 8, 4], strides = [1, 1, 1]} : vector<8x8x4xbf16> to vector<1x8x4xbf16>
    %15 = vector.shape_cast %14 : vector<1x8x4xbf16> to vector<8x4xbf16>
    %c17 = arith.constant 17 : index
    %c0_5 = arith.constant 0 : index
    %16 = vector.load %arg6[%c17, %c0_5] : memref<176x4xbf16, #tpu.memory_space<vmem>>, vector<8x4xbf16>
    tpu.vector_store %arg6[%c17, %c0_5], %15 {strides = array<i32>} : memref<176x4xbf16, #tpu.memory_space<vmem>>, vector<8x4xbf16>,
    %17 = vector.extract_strided_slice %11 {offsets = [1, 0, 0], sizes = [1, 8, 4], strides = [1, 1, 1]} : vector<8x8x4xbf16> to vector<1x8x4xbf16>
    %18 = vector.shape_cast %17 : vector<1x8x4xbf16> to vector<8x4xbf16>
    %c33 = arith.constant 33 : index
    %c0_6 = arith.constant 0 : index
    %19 = vector.load %arg6[%c33, %c0_6] : memref<176x4xbf16, #tpu.memory_space<vmem>>, vector<8x4xbf16>
    tpu.vector_store %arg6[%c33, %c0_6], %18 {strides = array<i32>} : memref<176x4xbf16, #tpu.memory_space<vmem>>, vector<8x4xbf16>,
    %20 = vector.extract_strided_slice %11 {offsets = [2, 0, 0], sizes = [1, 8, 4], strides = [1, 1, 1]} : vector<8x8x4xbf16> to vector<1x8x4xbf16>
    %21 = vector.shape_cast %20 : vector<1x8x4xbf16> to vector<8x4xbf16>
    %c49 = arith.constant 49 : index
    %c0_7 = arith.constant 0 : index
    %22 = vector.load %arg6[%c49, %c0_7] : memref<176x4xbf16, #tpu.memory_space<vmem>>, vector<8x4xbf16>
    tpu.vector_store %arg6[%c49, %c0_7], %21 {strides = array<i32>} : memref<176x4xbf16, #tpu.memory_space<vmem>>, vector<8x4xbf16>,
    %23 = vector.extract_strided_slice %11 {offsets = [3, 0, 0], sizes = [1, 8, 4], strides = [1, 1, 1]} : vector<8x8x4xbf16> to vector<1x8x4xbf16>
    %24 = vector.shape_cast %23 : vector<1x8x4xbf16> to vector<8x4xbf16>
    %c65 = arith.constant 65 : index
    %c0_8 = arith.constant 0 : index
    %25 = vector.load %arg6[%c65, %c0_8] : memref<176x4xbf16, #tpu.memory_space<vmem>>, vector<8x4xbf16>
    tpu.vector_store %arg6[%c65, %c0_8], %24 {strides = array<i32>} : memref<176x4xbf16, #tpu.memory_space<vmem>>, vector<8x4xbf16>,
    %26 = vector.extract_strided_slice %11 {offsets = [4, 0, 0], sizes = [1, 8, 4], strides = [1, 1, 1]} : vector<8x8x4xbf16> to vector<1x8x4xbf16>
    %27 = vector.shape_cast %26 : vector<1x8x4xbf16> to vector<8x4xbf16>
    %c81 = arith.constant 81 : index
    %c0_9 = arith.constant 0 : index
    %28 = vector.load %arg6[%c81, %c0_9] : memref<176x4xbf16, #tpu.memory_space<vmem>>, vector<8x4xbf16>
    tpu.vector_store %arg6[%c81, %c0_9], %27 {strides = array<i32>} : memref<176x4xbf16, #tpu.memory_space<vmem>>, vector<8x4xbf16>,
    %29 = vector.extract_strided_slice %11 {offsets = [5, 0, 0], sizes = [1, 8, 4], strides = [1, 1, 1]} : vector<8x8x4xbf16> to vector<1x8x4xbf16>
    %30 = vector.shape_cast %29 : vector<1x8x4xbf16> to vector<8x4xbf16>
    %c97 = arith.constant 97 : index
    %c0_10 = arith.constant 0 : index
    %31 = vector.load %arg6[%c97, %c0_10] : memref<176x4xbf16, #tpu.memory_space<vmem>>, vector<8x4xbf16>
    tpu.vector_store %arg6[%c97, %c0_10], %30 {strides = array<i32>} : memref<176x4xbf16, #tpu.memory_space<vmem>>, vector<8x4xbf16>,
    %32 = vector.extract_strided_slice %11 {offsets = [6, 0, 0], sizes = [1, 8, 4], strides = [1, 1, 1]} : vector<8x8x4xbf16> to vector<1x8x4xbf16>
    %33 = vector.shape_cast %32 : vector<1x8x4xbf16> to vector<8x4xbf16>
    %c113 = arith.constant 113 : index
    %c0_11 = arith.constant 0 : index
    %34 = vector.load %arg6[%c113, %c0_11] : memref<176x4xbf16, #tpu.memory_space<vmem>>, vector<8x4xbf16>
    tpu.vector_store %arg6[%c113, %c0_11], %33 {strides = array<i32>} : memref<176x4xbf16, #tpu.memory_space<vmem>>, vector<8x4xbf16>,
    %35 = vector.extract_strided_slice %11 {offsets = [7, 0, 0], sizes = [1, 8, 4], strides = [1, 1, 1]} : vector<8x8x4xbf16> to vector<1x8x4xbf16>
    %36 = vector.shape_cast %35 : vector<1x8x4xbf16> to vector<8x4xbf16>
    %c129 = arith.constant 129 : index
    %c0_12 = arith.constant 0 : index
    %37 = vector.load %arg6[%c129, %c0_12] : memref<176x4xbf16, #tpu.memory_space<vmem>>, vector<8x4xbf16>
    tpu.vector_store %arg6[%c129, %c0_12], %36 {strides = array<i32>} : memref<176x4xbf16, #tpu.memory_space<vmem>>, vector<8x4xbf16>,
    %c0_13 = arith.constant 0 : index
    %c0_14 = arith.constant 0 : index
    %38 = vector.load %arg6[%c0_13, %c0_14] : memref<176x4xbf16, #tpu.memory_space<vmem>>, vector<128x4xbf16>
    %c0_15 = arith.constant 0 : index
    %c0_16 = arith.constant 0 : index
    %c0_17 = arith.constant 0 : index
    %39 = vector.load %arg2[%c0_15, %c0_16, %c0_17] : memref<9x4x128xbf16, #tpu.memory_space<vmem>>, vector<1x4x128xbf16>
    %40 = vector.shape_cast %39 : vector<1x4x128xbf16> to vector<4x128xbf16>
    %cst_18 = arith.constant dense<0.000000e+00> : vector<128x128xf32>
    %41 = tpu.matmul %38, %40, %cst_18 {dimension_numbers = #tpu.dot_dimension_numbers<[1], [0], [0], [1], [0, 0, 1, 1], [], []>} : vector<128x4xbf16>, vector<4x128xbf16>, vector<128x128xf32> -> vector<128x128xf32>
    %c1 = arith.constant 1 : index
    %c0_19 = arith.constant 0 : index
    %42 = vector.load %arg6[%c1, %c0_19] : memref<176x4xbf16, #tpu.memory_space<vmem>>, vector<128x4xbf16>
    %c1_20 = arith.constant 1 : index
    %c0_21 = arith.constant 0 : index
    %c0_22 = arith.constant 0 : index
    %43 = vector.load %arg2[%c1_20, %c0_21, %c0_22] : memref<9x4x128xbf16, #tpu.memory_space<vmem>>, vector<1x4x128xbf16>
    %44 = vector.shape_cast %43 : vector<1x4x128xbf16> to vector<4x128xbf16>
    %cst_23 = arith.constant dense<0.000000e+00> : vector<128x128xf32>
    %45 = tpu.matmul %42, %44, %cst_23 {dimension_numbers = #tpu.dot_dimension_numbers<[1], [0], [0], [1], [0, 0, 1, 1], [], []>} : vector<128x4xbf16>, vector<4x128xbf16>, vector<128x128xf32> -> vector<128x128xf32>
    %46 = arith.addf %41, %45 : vector<128x128xf32>
    %c2 = arith.constant 2 : index
    %c0_24 = arith.constant 0 : index
    %47 = vector.load %arg6[%c2, %c0_24] : memref<176x4xbf16, #tpu.memory_space<vmem>>, vector<128x4xbf16>
    %c2_25 = arith.constant 2 : index
    %c0_26 = arith.constant 0 : index
    %c0_27 = arith.constant 0 : index
    %48 = vector.load %arg2[%c2_25, %c0_26, %c0_27] : memref<9x4x128xbf16, #tpu.memory_space<vmem>>, vector<1x4x128xbf16>
    %49 = vector.shape_cast %48 : vector<1x4x128xbf16> to vector<4x128xbf16>
    %cst_28 = arith.constant dense<0.000000e+00> : vector<128x128xf32>
    %50 = tpu.matmul %47, %49, %cst_28 {dimension_numbers = #tpu.dot_dimension_numbers<[1], [0], [0], [1], [0, 0, 1, 1], [], []>} : vector<128x4xbf16>, vector<4x128xbf16>, vector<128x128xf32> -> vector<128x128xf32>
    %51 = arith.addf %46, %50 : vector<128x128xf32>
    %c16 = arith.constant 16 : index
    %c0_29 = arith.constant 0 : index
    %52 = vector.load %arg6[%c16, %c0_29] : memref<176x4xbf16, #tpu.memory_space<vmem>>, vector<128x4xbf16>
    %c3 = arith.constant 3 : index
    %c0_30 = arith.constant 0 : index
    %c0_31 = arith.constant 0 : index
    %53 = vector.load %arg2[%c3, %c0_30, %c0_31] : memref<9x4x128xbf16, #tpu.memory_space<vmem>>, vector<1x4x128xbf16>
    %54 = vector.shape_cast %53 : vector<1x4x128xbf16> to vector<4x128xbf16>
    %cst_32 = arith.constant dense<0.000000e+00> : vector<128x128xf32>
    %55 = tpu.matmul %52, %54, %cst_32 {dimension_numbers = #tpu.dot_dimension_numbers<[1], [0], [0], [1], [0, 0, 1, 1], [], []>} : vector<128x4xbf16>, vector<4x128xbf16>, vector<128x128xf32> -> vector<128x128xf32>
    %56 = arith.addf %51, %55 : vector<128x128xf32>
    %c17_33 = arith.constant 17 : index
    %c0_34 = arith.constant 0 : index
    %57 = vector.load %arg6[%c17_33, %c0_34] : memref<176x4xbf16, #tpu.memory_space<vmem>>, vector<128x4xbf16>
    %c4 = arith.constant 4 : index
    %c0_35 = arith.constant 0 : index
    %c0_36 = arith.constant 0 : index
    %58 = vector.load %arg2[%c4, %c0_35, %c0_36] : memref<9x4x128xbf16, #tpu.memory_space<vmem>>, vector<1x4x128xbf16>
    %59 = vector.shape_cast %58 : vector<1x4x128xbf16> to vector<4x128xbf16>
    %cst_37 = arith.constant dense<0.000000e+00> : vector<128x128xf32>
    %60 = tpu.matmul %57, %59, %cst_37 {dimension_numbers = #tpu.dot_dimension_numbers<[1], [0], [0], [1], [0, 0, 1, 1], [], []>} : vector<128x4xbf16>, vector<4x128xbf16>, vector<128x128xf32> -> vector<128x128xf32>
    %61 = arith.addf %56, %60 : vector<128x128xf32>
    %c18 = arith.constant 18 : index
    %c0_38 = arith.constant 0 : index
    %62 = vector.load %arg6[%c18, %c0_38] : memref<176x4xbf16, #tpu.memory_space<vmem>>, vector<128x4xbf16>
    %c5 = arith.constant 5 : index
    %c0_39 = arith.constant 0 : index
    %c0_40 = arith.constant 0 : index
    %63 = vector.load %arg2[%c5, %c0_39, %c0_40] : memref<9x4x128xbf16, #tpu.memory_space<vmem>>, vector<1x4x128xbf16>
    %64 = vector.shape_cast %63 : vector<1x4x128xbf16> to vector<4x128xbf16>
    %cst_41 = arith.constant dense<0.000000e+00> : vector<128x128xf32>
    %65 = tpu.matmul %62, %64, %cst_41 {dimension_numbers = #tpu.dot_dimension_numbers<[1], [0], [0], [1], [0, 0, 1, 1], [], []>} : vector<128x4xbf16>, vector<4x128xbf16>, vector<128x128xf32> -> vector<128x128xf32>
    %66 = arith.addf %61, %65 : vector<128x128xf32>
    %c32 = arith.constant 32 : index
    %c0_42 = arith.constant 0 : index
    %67 = vector.load %arg6[%c32, %c0_42] : memref<176x4xbf16, #tpu.memory_space<vmem>>, vector<128x4xbf16>
    %c6 = arith.constant 6 : index
    %c0_43 = arith.constant 0 : index
    %c0_44 = arith.constant 0 : index
    %68 = vector.load %arg2[%c6, %c0_43, %c0_44] : memref<9x4x128xbf16, #tpu.memory_space<vmem>>, vector<1x4x128xbf16>
    %69 = vector.shape_cast %68 : vector<1x4x128xbf16> to vector<4x128xbf16>
    %cst_45 = arith.constant dense<0.000000e+00> : vector<128x128xf32>
    %70 = tpu.matmul %67, %69, %cst_45 {dimension_numbers = #tpu.dot_dimension_numbers<[1], [0], [0], [1], [0, 0, 1, 1], [], []>} : vector<128x4xbf16>, vector<4x128xbf16>, vector<128x128xf32> -> vector<128x128xf32>
    %71 = arith.addf %66, %70 : vector<128x128xf32>
    %c33_46 = arith.constant 33 : index
    %c0_47 = arith.constant 0 : index
    %72 = vector.load %arg6[%c33_46, %c0_47] : memref<176x4xbf16, #tpu.memory_space<vmem>>, vector<128x4xbf16>
    %c7 = arith.constant 7 : index
    %c0_48 = arith.constant 0 : index
    %c0_49 = arith.constant 0 : index
    %73 = vector.load %arg2[%c7, %c0_48, %c0_49] : memref<9x4x128xbf16, #tpu.memory_space<vmem>>, vector<1x4x128xbf16>
    %74 = vector.shape_cast %73 : vector<1x4x128xbf16> to vector<4x128xbf16>
    %cst_50 = arith.constant dense<0.000000e+00> : vector<128x128xf32>
    %75 = tpu.matmul %72, %74, %cst_50 {dimension_numbers = #tpu.dot_dimension_numbers<[1], [0], [0], [1], [0, 0, 1, 1], [], []>} : vector<128x4xbf16>, vector<4x128xbf16>, vector<128x128xf32> -> vector<128x128xf32>
    %76 = arith.addf %71, %75 : vector<128x128xf32>
    %c34 = arith.constant 34 : index
    %c0_51 = arith.constant 0 : index
    %77 = vector.load %arg6[%c34, %c0_51] : memref<176x4xbf16, #tpu.memory_space<vmem>>, vector<128x4xbf16>
    %c8 = arith.constant 8 : index
    %c0_52 = arith.constant 0 : index
    %c0_53 = arith.constant 0 : index
    %78 = vector.load %arg2[%c8, %c0_52, %c0_53] : memref<9x4x128xbf16, #tpu.memory_space<vmem>>, vector<1x4x128xbf16>
    %79 = vector.shape_cast %78 : vector<1x4x128xbf16> to vector<4x128xbf16>
    %cst_54 = arith.constant dense<0.000000e+00> : vector<128x128xf32>
    %80 = tpu.matmul %77, %79, %cst_54 {dimension_numbers = #tpu.dot_dimension_numbers<[1], [0], [0], [1], [0, 0, 1, 1], [], []>} : vector<128x4xbf16>, vector<4x128xbf16>, vector<128x128xf32> -> vector<128x128xf32>
    %81 = arith.addf %76, %80 : vector<128x128xf32>
    %c0_55 = arith.constant 0 : index
    %c0_56 = arith.constant 0 : index
    %82 = vector.load %arg3[%c0_55, %c0_56] : memref<1x128xf32, #tpu.memory_space<vmem>>, vector<1x128xf32>
    %83 = vector.broadcast %82 : vector<1x128xf32> to vector<128x128xf32>
    %84 = arith.addf %81, %83 : vector<128x128xf32>
    %85 = tpu.iota {dimensions = array<i32: 0>} : vector<128x1xi32>
    %c16_i32 = arith.constant 16 : i32
    %c0_i32 = arith.constant 0 : i32
    %86 = arith.cmpi eq, %c16_i32, %c0_i32 : i32
    %c1_i32 = arith.constant 1 : i32
    %87 = arith.select %86, %c1_i32, %c16_i32 : i32
    %88 = vector.broadcast %87 : i32 to vector<128x1xi32>
    %89 = arith.remsi %85, %88 : vector<128x1xi32>
    %c0_i32_57 = arith.constant 0 : i32
    %90 = vector.broadcast %c0_i32_57 : i32 to vector<128x1xi32>
    %91 = arith.cmpi ne, %89, %90 : vector<128x1xi32>
    %c0_i32_58 = arith.constant 0 : i32
    %92 = vector.broadcast %c0_i32_58 : i32 to vector<128x1xi32>
    %93 = arith.cmpi slt, %89, %92 : vector<128x1xi32>
    %c0_i32_59 = arith.constant 0 : i32
    %94 = arith.cmpi slt, %87, %c0_i32_59 : i32
    %95 = vector.broadcast %94 : i1 to vector<128x1xi1>
    %96 = vector.broadcast %95 : vector<128x1xi1> to vector<128x1xi1>
    %97 = arith.xori %93, %96 : vector<128x1xi1>
    %98 = arith.andi %97, %91 : vector<128x1xi1>
    %99 = vector.broadcast %87 : i32 to vector<128x1xi32>
    %100 = arith.addi %89, %99 : vector<128x1xi32>
    %101 = arith.select %98, %100, %89 : vector<128x1xi1>, vector<128x1xi32>
    %c8_i32 = arith.constant 8 : i32
    %102 = vector.broadcast %c8_i32 : i32 to vector<128x1xi32>
    %103 = arith.cmpi slt, %101, %102 : vector<128x1xi32>
    %cst_60 = arith.constant 0.000000e+00 : f32
    %104 = vector.shape_cast %103 : vector<128x1xi1> to vector<128x1xi1>
    %105 = vector.broadcast %104 : vector<128x1xi1> to vector<128x128xi1>
    %106 = vector.broadcast %cst_60 : f32 to vector<128x128xf32>
    %107 = arith.select %105, %84, %106 : vector<128x128xi1>, vector<128x128xf32>
    %cst_61 = arith.constant dense<0.000000e+00> : vector<128xf32>
    %108 = vector.multi_reduction <add>, %107, %cst_61 [0] : vector<128x128xf32> to vector<128xf32>
    %109 = vector.shape_cast %108 : vector<128xf32> to vector<1x128xf32>
    %c0_62 = arith.constant 0 : index
    %c0_63 = arith.constant 0 : index
    %c0_64 = arith.constant 0 : index
    %110 = vector.load %arg5[%c0_62, %c0_63, %c0_64] : memref<1x2x128xf32, #tpu.memory_space<vmem>>, vector<1x1x128xf32>
    %111 = vector.shape_cast %110 : vector<1x1x128xf32> to vector<1x128xf32>
    %112 = vector.shape_cast %109 : vector<1x128xf32> to vector<1x1x128xf32>
    tpu.vector_store %arg5[%c0_62, %c0_63, %c0_64], %112 {strides = array<i32>} : memref<1x2x128xf32, #tpu.memory_space<vmem>>, vector<1x1x128xf32>,
    %113 = arith.mulf %107, %107 : vector<128x128xf32>
    %cst_65 = arith.constant dense<0.000000e+00> : vector<128xf32>
    %114 = vector.multi_reduction <add>, %113, %cst_65 [0] : vector<128x128xf32> to vector<128xf32>
    %115 = vector.shape_cast %114 : vector<128xf32> to vector<1x128xf32>
    %c0_66 = arith.constant 0 : index
    %c1_67 = arith.constant 1 : index
    %c0_68 = arith.constant 0 : index
    %116 = vector.load %arg5[%c0_66, %c1_67, %c0_68] : memref<1x2x128xf32, #tpu.memory_space<vmem>>, vector<1x1x128xf32>
    %117 = vector.shape_cast %116 : vector<1x1x128xf32> to vector<1x128xf32>
    %118 = vector.shape_cast %115 : vector<1x128xf32> to vector<1x1x128xf32>
    tpu.vector_store %arg5[%c0_66, %c1_67, %c0_68], %118 {strides = array<i32>} : memref<1x2x128xf32, #tpu.memory_space<vmem>>, vector<1x1x128xf32>,
    %119 = arith.truncf %84 : vector<128x128xf32> to vector<128x128xbf16>
    %c0_69 = arith.constant 0 : index
    %c0_70 = arith.constant 0 : index
    %c0_71 = arith.constant 0 : index
    %120 = vector.load %arg4[%c0_69, %c0_70, %c0_71] : memref<1x128x128xbf16, #tpu.memory_space<vmem>>, vector<1x128x128xbf16>
    %121 = vector.shape_cast %120 : vector<1x128x128xbf16> to vector<128x128xbf16>
    %122 = vector.shape_cast %119 : vector<128x128xbf16> to vector<1x128x128xbf16>
    tpu.vector_store %arg4[%c0_69, %c0_70, %c0_71], %122 {strides = array<i32>} : memref<1x128x128xbf16, #tpu.memory_space<vmem>>, vector<1x128x128xbf16>,
    return
  }
  func.func @transform_0(%arg0: i32) -> (i32, i32, i32, i32) {
    %c0_i32 = arith.constant 0 : i32
    %c0_i32_0 = arith.constant 0 : i32
    %c0_i32_1 = arith.constant 0 : i32
    %c0_i32_2 = arith.constant 0 : i32
    return %arg0, %c0_i32, %c0_i32_0, %c0_i32_1 : i32, i32, i32, i32
  }
  func.func @transform_1(%arg0: i32) -> (i32, i32, i32) {
    %c0_i32 = arith.constant 0 : i32
    %c0_i32_0 = arith.constant 0 : i32
    %c0_i32_1 = arith.constant 0 : i32
    %c0_i32_2 = arith.constant 0 : i32
    return %c0_i32, %c0_i32_0, %c0_i32_1 : i32, i32, i32
  }
  func.func @transform_2(%arg0: i32) -> (i32, i32) {
    %c0_i32 = arith.constant 0 : i32
    %c0_i32_0 = arith.constant 0 : i32
    %c0_i32_1 = arith.constant 0 : i32
    return %c0_i32, %c0_i32_0 : i32, i32
  }
  func.func @transform_3(%arg0: i32) -> (i32, i32, i32) {
    %c0_i32 = arith.constant 0 : i32
    %c0_i32_0 = arith.constant 0 : i32
    %c0_i32_1 = arith.constant 0 : i32
    return %arg0, %c0_i32, %c0_i32_0 : i32, i32, i32
  }
  func.func @transform_4(%arg0: i32) -> (i32, i32, i32) {
    %c0_i32 = arith.constant 0 : i32
    %c0_i32_0 = arith.constant 0 : i32
    %c0_i32_1 = arith.constant 0 : i32
    return %arg0, %c0_i32, %c0_i32_0 : i32, i32, i32
  }
}

module attributes {stable_mosaic.version = 11 : i64} {
  func.func @_bn_relu_kernel(%arg0: i32, %arg1: memref<1x8x16x128xbf16, #tpu.memory_space<vmem>>, %arg2: memref<1x128xf32, #tpu.memory_space<vmem>>, %arg3: memref<1x128xf32, #tpu.memory_space<vmem>>, %arg4: memref<1x8x8x128xf32, #tpu.memory_space<vmem>>) attributes {dimension_semantics = [#tpu.dimension_semantics<parallel>], iteration_bounds = array<i64: 2>, scalar_prefetch = 0 : i64, scratch_operands = 0 : i64, tpu.core_type = #tpu.core_type<tc>, window_params = [{transform_indices = @transform_0, window_bounds = array<i64: 1, 8, 16, 128>}, {pipeline_mode = #tpu.pipeline_mode<synchronous>, transform_indices = @transform_1, window_bounds = array<i64: 1, 128>}, {pipeline_mode = #tpu.pipeline_mode<synchronous>, transform_indices = @transform_2, window_bounds = array<i64: 1, 128>}, {transform_indices = @transform_3, window_bounds = array<i64: 1, 8, 8, 128>}]} {
    %c0 = arith.constant 0 : index
    %c0_0 = arith.constant 0 : index
    %c0_1 = arith.constant 0 : index
    %c0_2 = arith.constant 0 : index
    %0 = vector.load %arg1[%c0, %c0_0, %c0_1, %c0_2] : memref<1x8x16x128xbf16, #tpu.memory_space<vmem>>, vector<1x8x16x128xbf16>
    %1 = vector.shape_cast %0 : vector<1x8x16x128xbf16> to vector<8x16x128xbf16>
    %2 = arith.extf %1 : vector<8x16x128xbf16> to vector<8x16x128xf32>
    %c0_3 = arith.constant 0 : index
    %c0_4 = arith.constant 0 : index
    %3 = vector.load %arg2[%c0_3, %c0_4] : memref<1x128xf32, #tpu.memory_space<vmem>>, vector<1x128xf32>
    %4 = vector.shape_cast %3 : vector<1x128xf32> to vector<1x1x128xf32>
    %5 = vector.broadcast %4 : vector<1x1x128xf32> to vector<8x16x128xf32>
    %6 = arith.mulf %2, %5 : vector<8x16x128xf32>
    %c0_5 = arith.constant 0 : index
    %c0_6 = arith.constant 0 : index
    %7 = vector.load %arg3[%c0_5, %c0_6] : memref<1x128xf32, #tpu.memory_space<vmem>>, vector<1x128xf32>
    %8 = vector.shape_cast %7 : vector<1x128xf32> to vector<1x1x128xf32>
    %9 = vector.broadcast %8 : vector<1x1x128xf32> to vector<8x16x128xf32>
    %10 = arith.addf %6, %9 : vector<8x16x128xf32>
    %cst = arith.constant 0.000000e+00 : f32
    %11 = vector.broadcast %cst : f32 to vector<8x16x128xf32>
    %12 = arith.maximumf %10, %11 : vector<8x16x128xf32>
    %13 = vector.extract_strided_slice %12 {offsets = [0, 0, 0], sizes = [8, 8, 128], strides = [1, 1, 1]} : vector<8x16x128xf32> to vector<8x8x128xf32>
    %c0_7 = arith.constant 0 : index
    %c0_8 = arith.constant 0 : index
    %c0_9 = arith.constant 0 : index
    %c0_10 = arith.constant 0 : index
    %14 = vector.load %arg4[%c0_7, %c0_8, %c0_9, %c0_10] : memref<1x8x8x128xf32, #tpu.memory_space<vmem>>, vector<1x8x8x128xf32>
    %15 = vector.shape_cast %14 : vector<1x8x8x128xf32> to vector<8x8x128xf32>
    %16 = vector.shape_cast %13 : vector<8x8x128xf32> to vector<1x8x8x128xf32>
    tpu.vector_store %arg4[%c0_7, %c0_8, %c0_9, %c0_10], %16 {strides = array<i32>} : memref<1x8x8x128xf32, #tpu.memory_space<vmem>>, vector<1x8x8x128xf32>,
    return
  }
  func.func @transform_0(%arg0: i32) -> (i32, i32, i32, i32) {
    %c0_i32 = arith.constant 0 : i32
    %c0_i32_0 = arith.constant 0 : i32
    %c0_i32_1 = arith.constant 0 : i32
    %c0_i32_2 = arith.constant 0 : i32
    return %arg0, %c0_i32, %c0_i32_0, %c0_i32_1 : i32, i32, i32, i32
  }
  func.func @transform_1(%arg0: i32) -> (i32, i32) {
    %c0_i32 = arith.constant 0 : i32
    %c0_i32_0 = arith.constant 0 : i32
    %c0_i32_1 = arith.constant 0 : i32
    return %c0_i32, %c0_i32_0 : i32, i32
  }
  func.func @transform_2(%arg0: i32) -> (i32, i32) {
    %c0_i32 = arith.constant 0 : i32
    %c0_i32_0 = arith.constant 0 : i32
    %c0_i32_1 = arith.constant 0 : i32
    return %c0_i32, %c0_i32_0 : i32, i32
  }
  func.func @transform_3(%arg0: i32) -> (i32, i32, i32, i32) {
    %c0_i32 = arith.constant 0 : i32
    %c0_i32_0 = arith.constant 0 : i32
    %c0_i32_1 = arith.constant 0 : i32
    %c0_i32_2 = arith.constant 0 : i32
    return %arg0, %c0_i32, %c0_i32_0, %c0_i32_1 : i32, i32, i32, i32
  }
}

</mosaic_0001>

<bundles_post_ra>
// kernel: down_forward.3
= control target key start
LH: loop header
LB: loop body
LE: loop exit
PB: predicated region body
PF: predicated region fallthrough
CT: control target
= control target key end

     0   :  { %s339_s12 = smov 0   ;;  %s365_s0 = inlined_call_operand.vmem [shape: bf16[2,8,16,128], index: 0, kind: input, shape index: {}]   ;;  %s366_s1 = inlined_call_operand.vmem [shape: f32[1,128], index: 1, kind: input, shape index: {}]   ;;  %s367_s2 = inlined_call_operand.vmem [shape: f32[1,128], index: 2, kind: input, shape index: {}]   ;;  %s368_s3 = inlined_call_operand.vmem [shape: f32[2,8,8,128], index: 3, kind: output, shape index: {}]  }
   0x1 LB: > { %s288_s13 = sadd.s32 4294967295, %s317_s12   ;;  %p292_p0 = scmp.ge.s32.totalorder %s317_s12, 1  ;;  %s317_s12 = sphi %s339_s12, %s13_s12  }
   0x2   : > { %p137_p1 = scmp.lt.s32.totalorder %s317_s12, 3 }
   0x4   : > { %p138_p2 = pnand %p292_p0, %p137_p1 }
   0x5   : > { %p161_p3 = scmp.lt.s32.totalorder (!%p138_p2), %s288_s13, 1 }
   0x6   : > { %141 = sbr.rel (%p138_p2) target bundleno = 27 (0x1b), region = 32 }
   0xb   : > { %s370_s13 = smov (!%p161_p3, %s288_s13), 1  ;;  %v297_v0 = vld [vmem:[%s366_s1] ss:$0 sm:$0xff] }
   0xc   : > { %s301_s14 = sshll.u32 %s370_s13, 6  ;;  %v298_v9 = vld [vmem:[%s367_s2] ss:$0 sm:$0xff] }
   0xd   : > { %s165_s17 = scalar_lea.vmem %s365_s0, %s301_s14  ;;  %s170_s24 = scalar_lea.vmem %s368_s3, %s301_s14 }
   0xe   : > { %v171_v1 = vld [vmem:[%s165_s17] ss:$8 sps:$4 sm:$0xff]   ;;  %v173_v2 = vld [vmem:[%s165_s17 + $0x10] ss:$8 sps:$4 sm:$0xff]  }
   0xf   : > { %v175_v3 = vld [vmem:[%s165_s17 + $0x20] ss:$8 sps:$4 sm:$0xff]   ;;  %v179_v4 = vunpack.c.l.bf16 %v171_v1  ;;  %v180_v5 = vunpack.c.h.bf16 %v171_v1  ;;  %v181_v6 = vunpack.c.l.bf16 %v173_v2  ;;  %v182_v7 = vunpack.c.h.bf16 %v173_v2  ;;  %v177_v8 = vld [vmem:[%s165_s17 + $0x30] ss:$8 sps:$4 sm:$0xff]  }
  0x10   : > { %v183_v10 = vunpack.c.l.bf16 %v175_v3  ;;  %v184_v11 = vunpack.c.h.bf16 %v175_v3  ;;  %v185_v12 = vunpack.c.l.bf16 %v177_v8  ;;  %v186_v13 = vunpack.c.h.bf16 %v177_v8 }
  0x11   : > { %v194_v14 = vmul.f32 %v297_v0, %v179_v4  ;;  %v195_v15 = vmul.f32 %v297_v0, %v180_v5  ;;  %v196_v16 = vmul.f32 %v297_v0, %v181_v6  ;;  %v197_v17 = vmul.f32 %v297_v0, %v182_v7 }
  0x12   : > { %v198_v18 = vmul.f32 %v297_v0, %v183_v10  ;;  %v199_v19 = vmul.f32 %v297_v0, %v184_v11  ;;  %v200_v20 = vmul.f32 %v297_v0, %v185_v12  ;;  %v201_v21 = vmul.f32 %v297_v0, %v186_v13 }
  0x13   : > { %v209_v22 = vadd.f32 %v298_v9, %v194_v14  ;;  %v210_v23 = vadd.f32 %v298_v9, %v195_v15  ;;  %v211_v24 = vadd.f32 %v298_v9, %v196_v16  ;;  %v212_v25 = vadd.f32 %v298_v9, %v197_v17 }
  0x14   : > { %v213_v26 = vadd.f32 %v298_v9, %v198_v18  ;;  %v214_v27 = vadd.f32 %v298_v9, %v199_v19  ;;  %v215_v28 = vadd.f32 %v298_v9, %v200_v20  ;;  %v216_v29 = vadd.f32 %v298_v9, %v201_v21 }
  0x15   : > { %v217_v30 = vmax.f32 %v209_v22, 0.0  ;;  %v218_v31 = vmax.f32 %v210_v23, 0.0  ;;  %v219_v32 = vmax.f32 %v211_v24, 0.0  ;;  %v220_v33 = vmax.f32 %v212_v25, 0.0 }
  0x16   : > { %v221_v34 = vmax.f32 %v213_v26, 0.0  ;;  %v222_v35 = vmax.f32 %v214_v27, 0.0  ;;  %v223_v36 = vmax.f32 %v215_v28, 0.0  ;;  %v224_v37 = vmax.f32 %v216_v29, 0.0 }
  0x17   : > { %225 = vst [vmem:[%s170_s24] sm:$0xff] %v217_v30  ;;  %226 = vst [vmem:[%s170_s24 + $0x8] sm:$0xff] %v218_v31 }
  0x18   : > { %227 = vst [vmem:[%s170_s24 + $0x10] sm:$0xff] %v219_v32  ;;  %228 = vst [vmem:[%s170_s24 + $0x18] sm:$0xff] %v220_v33 }
  0x19   : > { %229 = vst [vmem:[%s170_s24 + $0x20] sm:$0xff] %v221_v34  ;;  %230 = vst [vmem:[%s170_s24 + $0x28] sm:$0xff] %v222_v35 }
  0x1a   : > { %231 = vst [vmem:[%s170_s24 + $0x30] sm:$0xff] %v223_v36  ;;  %232 = vst [vmem:[%s170_s24 + $0x38] sm:$0xff] %v224_v37 }
  0x1b PF: > { %s13_s12 = sadd.s32 1, %s317_s12  }
  0x1c   : > { %p10_p4 = scmp.ge.s32.totalorder %s13_s12, 4  }
  0x1e   :  { %12 = sbr.rel (!%p10_p4) target bundleno = 1 (0x1), region = 62 }

// kernel: down_forward.2
= control target key start
LH: loop header
LB: loop body
LE: loop exit
PB: predicated region body
PF: predicated region fallthrough
CT: control target
= control target key end

     0   :  { %s3365_s15 = smov 0   ;;  %s4041_s0 = inlined_call_operand.vmem [shape: bf16[16,2,8,8], index: 0, kind: input, shape index: {}]   ;;  %s4042_s1 = inlined_call_operand.vmem [shape: bf16[9,4,128], index: 1, kind: input, shape index: {}]   ;;  %s4043_s2 = inlined_call_operand.vmem [shape: f32[1,128], index: 2, kind: input, shape index: {}]   ;;  %s4044_s3 = inlined_call_operand.vmem [shape: bf16[2,128,128], index: 3, kind: output, shape index: {0}]   ;;  %s4045_s4 = inlined_call_operand.vmem [shape: f32[2,2,128], index: 4, kind: output, shape index: {1}]  }
   0x1 LB: > { %s3371_s16 = sadd.s32 4294967295, %s3336_s15   ;;  %p2802_p0 = scmp.ge.s32.totalorder %s3336_s15, 1  ;;  %s3336_s15 = sphi %s3365_s15, %s15_s15  }
   0x2   : > { %p167_p1 = scmp.lt.s32.totalorder %s3336_s15, 3 }
   0x4   : > { %p168_p2 = pnand %p2802_p0, %p167_p1 }
   0x6   : > { %171 = sbr.rel (%p168_p2) target bundleno = 534 (0x216), region = 32 }
   0xb   : > { %s2803_s17 = sshll.u32 %s3371_s16, 3  ;;  %vm319_vm0 = vcmask 27648   ;;  %v3338_v0 = vmov 0   ;;  %s3339_s23 = smov 124   ;;  %v2809_v15 = vld [vmem:[%s4042_s1 + $0x2] sm:$0x3] }
   0xc   : > { %p3376_p3 = scmp.lt.s32.totalorder %s2803_s17, 15  ;;  %330 = vst.msk [vmem:[#allocation2 + $0x28] sm:$0xf] %vm319_vm0, %v3338_v0  ;;  %331 = vst.msk [vmem:[#allocation2 + $0x2c] sm:$0xf] %vm319_vm0, %v3338_v0  ;;  %vm633_vm1 = vcmask 1041408  }
   0xd   : > { %320 = vst.msk [vmem:[#allocation2] sm:$0xf] %vm319_vm0, %v3338_v0  ;;  %321 = vst.msk [vmem:[#allocation2 + $0x4] sm:$0xf] %vm319_vm0, %v3338_v0  ;;  %3265 = vmatprep.subr.msk.bf16.mxu1 %vm633_vm1, %v2809_v15  ;;  %v635_v16 = vsel %vm633_vm1, %v2809_v15, 0  ;;  %3264 = vmatprep.subr.msk.bf16.mxu0 %vm633_vm1, %v2809_v15  ;;  %vm358_vm3 = vcmask 24576  }
   0xe   : > { %322 = vst.msk [vmem:[#allocation2 + $0x8] sm:$0xf] %vm319_vm0, %v3338_v0  ;;  %323 = vst.msk [vmem:[#allocation2 + $0xc] sm:$0xf] %vm319_vm0, %v3338_v0  ;;  %s4090_s17 = smov (!%p3376_p3, %s2803_s17), 15  ;;  %3263 = vmatpush3.bf16.msra.mxu1 %v635_v16  ;;  %3101 = vmatpush3.bf16.msra.mxu0 %v635_v16  ;;  %vm608_vm8 = vcmask 31744  }
   0xf   : > { %324 = vst.msk [vmem:[#allocation2 + $0x10] sm:$0xf] %vm319_vm0, %v3338_v0  ;;  %325 = vst.msk [vmem:[#allocation2 + $0x14] sm:$0xf] %vm319_vm0, %v3338_v0  ;;  %s2954_s19 = sshll.u32 %s4090_s17, 3  ;;  %vm856_vm9 = vcmask 1046528  }
  0x10   : > { %326 = vst.msk [vmem:[#allocation2 + $0x18] sm:$0xf] %vm319_vm0, %v3338_v0  ;;  %327 = vst.msk [vmem:[#allocation2 + $0x1c] sm:$0xf] %vm319_vm0, %v3338_v0  ;;  %s3406_s22 = scalar_lea.vmem %s4041_s0, %s2954_s19  ;;  %v3485_v19 = vld [vmem:[%s4042_s1] sm:$0x3] }
  0x11   : > { %328 = vst.msk [vmem:[#allocation2 + $0x20] sm:$0xf] %vm319_vm0, %v3338_v0  ;;  %329 = vst.msk [vmem:[#allocation2 + $0x24] sm:$0xf] %vm319_vm0, %v3338_v0  ;;  %v223_v1 = vld [vmem:[%s3406_s22 + $0x20] sm:$0xf]  ;;  %3266 = vmatprep.subr.msk.bf16.mxu1 %vm633_vm1, %v3485_v19 }
  0x12   : > { %332 = vst.msk [vmem:[#allocation2 + $0x30] sm:$0xf] %vm319_vm0, %v3338_v0  ;;  %333 = vst.msk [vmem:[#allocation2 + $0x34] sm:$0xf] %vm319_vm0, %v3338_v0  ;;  %v221_v2 = vld [vmem:[%s3406_s22 + $0x18] sm:$0xf]  ;;  %247 = vrot.lane.b32.xlu1 %v223_v1, %s3339_s23 }
  0x13   : > { %334 = vst.msk [vmem:[#allocation2 + $0x38] sm:$0xf] %vm319_vm0, %v3338_v0  ;;  %335 = vst.msk [vmem:[#allocation2 + $0x3c] sm:$0xf] %vm319_vm0, %v3338_v0  ;;  %245 = vrot.lane.b32.xlu0 %v221_v2, %s3339_s23  ;;  %v224_v3 = vld [vmem:[%s3406_s22 + $0x24] sm:$0xf] }
  0x14   : > { %336 = vst.msk [vmem:[#allocation2 + $0x40] sm:$0xf] %vm319_vm0, %v3338_v0  ;;  %337 = vst.msk [vmem:[#allocation2 + $0x44] sm:$0xf] %vm319_vm0, %v3338_v0  ;;  %v222_v4 = vld [vmem:[%s3406_s22 + $0x1c] sm:$0xf] }
  0x15   : > { %338 = vst.msk [vmem:[#allocation2 + $0x48] sm:$0xf] %vm319_vm0, %v3338_v0  ;;  %339 = vst.msk [vmem:[#allocation2 + $0x4c] sm:$0xf] %vm319_vm0, %v3338_v0  ;;  %v3417_v5 = vld [vmem:[%s3406_s22 + $0x28] sm:$0xf] }
  0x16   : > { %340 = vst.msk [vmem:[#allocation2 + $0x50] sm:$0xf] %vm319_vm0, %v3338_v0  ;;  %287 = vrot.lane.b32.xlu1 %v224_v3, %s3339_s23  ;;  %v3420_v6 = vld [vmem:[%s3406_s22] sm:$0xf]  ;;  %v3427_v7 = vld [vmem:[%s3406_s22 + $0x2c] sm:$0xf] }
  0x17   : > { %285 = vrot.lane.b32.xlu0 %v222_v4, %s3339_s23  ;;  %v3430_v8 = vld [vmem:[%s3406_s22 + $0x4] sm:$0xf]  ;;  %v3437_v9 = vld [vmem:[%s3406_s22 + $0xc] sm:$0xf]  ;;  %v3440_v10 = vld [vmem:[%s3406_s22 + $0x8] sm:$0xf] }
  0x18   : > { %v3447_v11 = vld [vmem:[%s3406_s22 + $0x34] sm:$0xf]  ;;  %v3450_v12 = vld [vmem:[%s3406_s22 + $0x30] sm:$0xf]  ;;  %v3457_v13 = vld [vmem:[%s3406_s22 + $0x38] sm:$0xf] }
  0x19   : > { %v3460_v14 = vld [vmem:[%s3406_s22 + $0x10] sm:$0xf]  ;;  %v3473_v17 = vld [vmem:[%s3406_s22 + $0x3c] sm:$0xf]  ;;  %v3476_v18 = vld [vmem:[%s3406_s22 + $0x14] sm:$0xf] }
  0x1a   : > { %249 = vrot.lane.b32.xlu1 %v3417_v5, %s3339_s23  ;;  %v3492_v20 = vld [vmem:[%s4042_s1 + $0x4] sm:$0x3]  ;;  %vm353_vm2 = vsmask.f32 7938  ;;  %vm359_vm4 = vsmask.f32 256 }
  0x1b   : > { %239 = vrot.lane.b32.xlu0 %v3420_v6, %s3339_s23  ;;  %3267 = vmatprep.subr.msk.bf16.mxu0 %vm633_vm1, %v3492_v20  ;;  %v476_v35 = vld [vmem:[#allocation2] sm:$0xf]  ;;  %v3496_v36 = vld [vmem:[#allocation2 + $0x4] sm:$0xf]  ;;  %vm3499_vm5 = vmand %vm319_vm0, %vm353_vm2  ;;  %vm539_vm7 = vsmask.f32 7424 }
  0x1c   : > { %vm3503_vm6 = vmand %vm358_vm3, %vm359_vm4  ;;  %v422_v39 = vld [vmem:[#allocation2 + $0x28] sm:$0xf]  ;;  %v425_v44 = vld [vmem:[#allocation2 + $0x2c] sm:$0x1]  ;;  %v3508_v49 = vcombine.low %v476_v35, %v3496_v36  ;;  %v899_v38 = vsel %vm633_vm1, %v3492_v20, 0  ;;  %p205_p4 = scmp.lt.s32.totalorder %s3371_s16, 1 }
  0x1d   : > { %v406_v45 = vld [vmem:[#allocation2 + $0x20] sm:$0xf]  ;;  %v409_v46 = vld [vmem:[#allocation2 + $0x24] sm:$0x1]  ;;  %v441_v15 = vld [vmem:[#allocation2 + $0x34] sm:$0x1] }
  0x1e   : > { %289 = vrot.lane.b32.xlu1 %v3427_v7, %s3339_s23  ;;  %v377_v35 = vld [vmem:[#allocation2 + $0x14] sm:$0x1]  ;;  %s4092_s16 = smov (!%p205_p4, %s3371_s16), 1 }
  0x1f   : > { %279 = vrot.lane.b32.xlu0 %v3430_v8, %s3339_s23  ;;  %s2955_s20 = sshll.u32 %s4092_s16, 6  ;;  %s2808_s24 = sshll.u32 %s4092_s16, 1 }
  0x20   : > { %s213_s27 = scalar_lea.vmem %s4045_s4, %s2808_s24 }
  0x22   : > { %281 = vrot.lane.b32.xlu1 %v3437_v9, %s3339_s23 }
  0x23   : > { %241 = vrot.lane.b32.xlu0 %v3440_v10, %s3339_s23 }
  0x26   : > { %291 = vrot.lane.b32.xlu1 %v3447_v11, %s3339_s23 }
  0x27   : > { %251 = vrot.lane.b32.xlu0 %v3450_v12, %s3339_s23 }
  0x2a   : > { %253 = vrot.lane.b32.xlu1 %v3457_v13, %s3339_s23 }
  0x2b   : > { %243 = vrot.lane.b32.xlu0 %v3460_v14, %s3339_s23 }
  0x2e   : > { %293 = vrot.lane.b32.xlu1 %v3473_v17, %s3339_s23 }
  0x2f   : > { %283 = vrot.lane.b32.xlu0 %v3476_v18, %s3339_s23  ;;  %s3984_s23 = scalar_lea.vmem %s4044_s3, %s2955_s20 }
  0x84   : > { %v248_v21 = vpop.permute.xlu1 %247 }
  0x85   : > { %v246_v22 = vpop.permute.xlu0 %245  ;;  %v267_v25 = vmax.bf16 %v248_v21, %v223_v1 }
  0x86   : > { %v266_v26 = vmax.bf16 %v246_v22, %v221_v2 }
  0x88   : > { %v288_v23 = vpop.permute.xlu1 %287 }
  0x89   : > { %v286_v24 = vpop.permute.xlu0 %285  ;;  %v307_v27 = vmax.bf16 %v288_v23, %v224_v3 }
  0x8a   : > { %v306_v28 = vmax.bf16 %v286_v24, %v222_v4 }
  0x8b   : > { %v315_v29 = vmax.bf16 %v307_v27, %v267_v25  ;;  %v361_v27 = vld [vmem:[#allocation2 + $0xc] sm:$0x1] }
  0x8c   : > { %v314_v30 = vmax.bf16 %v306_v28, %v266_v26  ;;  %v250_v31 = vpop.permute.xlu1 %249  ;;  %v355_v26 = vld [vmem:[#allocation2 + $0x8] sm:$0xf] }
  0x8d   : > { %v240_v32 = vpop.permute.xlu0 %239  ;;  %v413_v33 = vshrl.u32 %v315_v29, 16  ;;  %v416_v41 = vshll.u32 %v315_v29, 16  ;;  %v268_v54 = vmax.bf16 %v250_v31, %v3417_v5 }
  0x8e   : > { %v397_v34 = vshrl.u32 %v314_v30, 16  ;;  %v400_v43 = vshll.u32 %v314_v30, 16  ;;  %v263_v55 = vmax.bf16 %v240_v32, %v3420_v6  ;;  %v438_v6 = vld [vmem:[#allocation2 + $0x30] sm:$0xf] }
  0x8f   : > { %v415_v40 = vrot.slane %v413_v33, 7 }
  0x90   : > { %v399_v42 = vrot.slane %v397_v34, 7  ;;  %v290_v47 = vpop.permute.xlu1 %289  ;;  %v374_v34 = vld [vmem:[#allocation2 + $0x10] sm:$0xf] }
  0x91   : > { %v280_v48 = vpop.permute.xlu0 %279  ;;  %v418_v50 = vor.u32 %v416_v41, %v415_v40  ;;  %v419_v51 = vrot.slane %v415_v40, 4  ;;  %v308_v56 = vmax.bf16 %v290_v47, %v3427_v7 }
  0x92   : > { %v402_v52 = vor.u32 %v400_v43, %v399_v42  ;;  %v403_v53 = vrot.slane %v399_v42, 4  ;;  %v303_v57 = vmax.bf16 %v280_v48, %v3430_v8  ;;  %v543_v8 = vshll.u32 %v3508_v49, 16 }
  0x93   : > { %v423_v58 = vsel %vm3499_vm5, %v418_v50, %v422_v39  ;;  %v426_v59 = vsel %vm3503_vm6, %v419_v51, %v425_v44  ;;  %v316_v62 = vmax.bf16 %v308_v56, %v268_v54  ;;  %v541_v51 = vshrl.u32 %v3508_v49, 16  ;;  %v454_v56 = vld [vmem:[#allocation2 + $0x38] sm:$0xf] }
  0x94   : > { %v407_v60 = vsel %vm3499_vm5, %v402_v52, %v406_v45  ;;  %v410_v61 = vsel %vm3503_vm6, %v403_v53, %v409_v46  ;;  %424 = vst [vmem:[#allocation2 + $0x28] sm:$0xf] %v423_v58  ;;  %427 = vst [vmem:[#allocation2 + $0x2c] sm:$0x1] %v426_v59  ;;  %v311_v63 = vmax.bf16 %v303_v57, %v263_v55  ;;  %v282_v0 = vpop.permute.xlu1 %281  ;;  %v457_v59 = vld [vmem:[#allocation2 + $0x3c] sm:$0x1] }
  0x95   : > { %408 = vst [vmem:[#allocation2 + $0x20] sm:$0xf] %v407_v60  ;;  %411 = vst [vmem:[#allocation2 + $0x24] sm:$0x1] %v410_v61  ;;  %v242_v1 = vpop.permute.xlu0 %241  ;;  %v304_v2 = vmax.bf16 %v282_v0, %v3437_v9  ;;  %v429_v4 = vshrl.u32 %v316_v62, 16  ;;  %v432_v21 = vshll.u32 %v316_v62, 16 }
  0x96   : > { %v264_v3 = vmax.bf16 %v242_v1, %v3440_v10  ;;  %v343_v5 = vshrl.u32 %v311_v63, 16  ;;  %v346_v23 = vshll.u32 %v311_v63, 16 }
  0x97   : > { %v431_v16 = vrot.slane %v429_v4, 7 }
  0x98   : > { %v312_v7 = vmax.bf16 %v304_v2, %v264_v3  ;;  %v345_v22 = vrot.slane %v343_v5, 7  ;;  %v292_v24 = vpop.permute.xlu1 %291 }
  0x99   : > { %v252_v25 = vpop.permute.xlu0 %251  ;;  %v309_v9 = vmax.bf16 %v292_v24, %v3447_v11  ;;  %v434_v30 = vor.u32 %v432_v21, %v431_v16  ;;  %v435_v31 = vrot.slane %v431_v16, 4 }
  0x9a   : > { %v365_v28 = vshrl.u32 %v312_v7, 16  ;;  %v368_v29 = vshll.u32 %v312_v7, 16  ;;  %v269_v10 = vmax.bf16 %v252_v25, %v3450_v12  ;;  %v348_v32 = vor.u32 %v346_v23, %v345_v22  ;;  %v473_v25 = vld [vmem:[#allocation2 + $0x44] sm:$0x1] }
  0x9b   : > { %v349_v33 = vrot.slane %v345_v22, 4  ;;  %v439_v42 = vsel %vm3499_vm5, %v434_v30, %v438_v6  ;;  %v442_v11 = vsel %vm3503_vm6, %v435_v31, %v441_v15  ;;  %v3537_v46 = vld [vmem:[#allocation2 + $0x28] sm:$0xff]   ;;  %v545_v15 = vrot.slane %v543_v8, 1  ;;  %v470_v8 = vld [vmem:[#allocation2 + $0x40] sm:$0xf] }
  0x9c   : > { %v367_v39 = vrot.slane %v365_v28, 7  ;;  %v317_v40 = vmax.bf16 %v309_v9, %v269_v10  ;;  %v3527_v41 = vld [vmem:[#allocation2 + $0x20] sm:$0xff]   ;;  %v356_v12 = vsel %vm3499_vm5, %v348_v32, %v355_v26  ;;  %v254_v44 = vpop.permute.xlu1 %253  ;;  %440 = vst [vmem:[#allocation2 + $0x30] sm:$0xf] %v439_v42  ;;  %443 = vst [vmem:[#allocation2 + $0x34] sm:$0x1] %v442_v11 }
  0x9d   : > { %v362_v43 = vsel %vm3503_vm6, %v349_v33, %v361_v27  ;;  %v244_v45 = vpop.permute.xlu0 %243  ;;  %357 = vst [vmem:[#allocation2 + $0x8] sm:$0xf] %v356_v12  ;;  %v572_v53 = vshll.u32 %v3527_v41, 16  ;;  %v580_v58 = vshll.u32 %v3537_v46, 16  ;;  %v270_v60 = vmax.bf16 %v254_v44, %v3457_v13  ;;  %v390_v27 = vld [vmem:[#allocation2 + $0x18] sm:$0xf] }
  0x9e   : > { %363 = vst [vmem:[#allocation2 + $0xc] sm:$0x1] %v362_v43  ;;  %v370_v47 = vor.u32 %v368_v29, %v367_v39  ;;  %v371_v48 = vrot.slane %v367_v39, 4  ;;  %v445_v50 = vshrl.u32 %v317_v40, 16  ;;  %v448_v52 = vshll.u32 %v317_v40, 16 }
  0x9f   : > { %v265_v61 = vmax.bf16 %v244_v45, %v3460_v14  ;;  %v3548_v0 = vrot.slane %v572_v53, 1  ;;  %v576_v1 = vshrl.u32 %v3527_v41, 16  ;;  %v582_v7 = vrot.slane %v580_v58, 1  ;;  %v393_v28 = vld [vmem:[#allocation2 + $0x1c] sm:$0x1] }
  0xa0   : > { %v375_v54 = vsel %vm3499_vm5, %v370_v47, %v374_v34  ;;  %v378_v55 = vsel %vm3503_vm6, %v371_v48, %v377_v35  ;;  %v447_v57 = vrot.slane %v445_v50, 7  ;;  %v294_v62 = vpop.permute.xlu1 %293  ;;  %v584_v24 = vshrl.u32 %v3537_v46, 16  ;;  %v2845_v50 = vld [vmem:[%s4042_s1 + $0x6] sm:$0x3] }
  0xa1   : > { %376 = vst [vmem:[#allocation2 + $0x10] sm:$0xf] %v375_v54  ;;  %379 = vst [vmem:[#allocation2 + $0x14] sm:$0x1] %v378_v55  ;;  %v284_v63 = vpop.permute.xlu0 %283  ;;  %v310_v4 = vmax.bf16 %v294_v62, %v3473_v17  ;;  %v578_v6 = vor.u32 %v576_v1, %v3548_v0  ;;  %v546_v9 = vor.u32 %v545_v15, %v541_v51  ;;  %v751_v40 = vsel %vm633_vm1, %v3485_v19, 0 }
  0xa2   : > { %v450_v2 = vor.u32 %v448_v52, %v447_v57  ;;  %v451_v3 = vrot.slane %v447_v57, 4  ;;  %v305_v5 = vmax.bf16 %v284_v63, %v3476_v18  ;;  %v586_v33 = vor.u32 %v584_v24, %v582_v7  ;;  %v850_v1 = vld [vmem:[#allocation2] sm:$0xe] }
  0xa3   : > { %v318_v16 = vmax.bf16 %v310_v4, %v270_v60  ;;  %v583_v22 = vsel %vm539_vm7, %v578_v6, %v582_v7  ;;  %v3564_v30 = vld [vmem:[#allocation2 + $0x30] sm:$0xff]   ;;  %v2862_v60 = vld [vmem:[%s4042_s1 + $0x8] sm:$0x3] }
  0xa4   : > { %v455_v13 = vsel %vm3499_vm5, %v450_v2, %v454_v56  ;;  %v458_v14 = vsel %vm3503_vm6, %v451_v3, %v457_v59  ;;  %v313_v21 = vmax.bf16 %v305_v5, %v265_v61  ;;  %3110 = vmatprep.mubr.msk.bf16.mxu1 %vm608_vm8, %v583_v22  ;;  %v588_v35 = vshll.u32 %v3564_v30, 16 }
  0xa5   : > { %456 = vst [vmem:[#allocation2 + $0x38] sm:$0xf] %v455_v13  ;;  %459 = vst [vmem:[#allocation2 + $0x3c] sm:$0x1] %v458_v14  ;;  %v3559_v23 = vld [vmem:[#allocation2 + $0x8] sm:$0xff]   ;;  %v461_v17 = vshrl.u32 %v318_v16, 16  ;;  %v2836_v3 = vcombine.low %v850_v1, %v3496_v36 }
  0xa6   : > { %v381_v18 = vshrl.u32 %v313_v21, 16  ;;  %v464_v26 = vshll.u32 %v318_v16, 16  ;;  %v384_v29 = vshll.u32 %v313_v21, 16  ;;  %v548_v10 = vshll.u32 %v3559_v23, 16  ;;  %v3689_v1 = vld [vmem:[%s4042_s1 + $0xe] sm:$0x3] }
  0xa7   : > { %v463_v31 = vrot.slane %v461_v17, 7  ;;  %v552_v45 = vshrl.u32 %v3559_v23, 16  ;;  %v590_v47 = vrot.slane %v588_v35, 1  ;;  %v592_v37 = vshrl.u32 %v3564_v30, 16 }
  0xa8   : > { %v383_v32 = vrot.slane %v381_v18, 7  ;;  %v550_v34 = vrot.slane %v548_v10, 1  ;;  %v3567_v39 = vld [vmem:[#allocation2 + $0x10] sm:$0xff]   ;;  %v857_v22 = vrot.slane %v2836_v3, 1  ;;  %v858_v17 = vrot.slane %v3559_v23, 1 }
  0xa9   : > { %v466_v42 = vor.u32 %v464_v26, %v463_v31  ;;  %v467_v11 = vrot.slane %v463_v31, 4  ;;  %v556_v48 = vshll.u32 %v3567_v39, 16  ;;  %v591_v56 = vsel %vm539_vm7, %v586_v33, %v590_v47  ;;  %v3642_v33 = vld [vmem:[#allocation2 + $0xc] sm:$0xf] }
  0xaa   : > { %v386_v12 = vor.u32 %v384_v29, %v383_v32  ;;  %v387_v43 = vrot.slane %v383_v32, 4  ;;  %v551_v44 = vsel %vm539_vm7, %v546_v9, %v550_v34  ;;  %v554_v55 = vor.u32 %v552_v45, %v550_v34  ;;  %3111 = vmatmul.mubr.msk.bf16.vlgmr.msra.gmra.mxu1 %vm608_vm8, %v591_v56  ;;  %v2880_v29 = vld [vmem:[%s4042_s1 + $0xa] sm:$0x3]  ;;  %v2890_v9 = vld [vmem:[%s4042_s1 + $0xc] sm:$0x3] }
  0xab   : > { %v471_v51 = vsel %vm3499_vm5, %v466_v42, %v470_v8  ;;  %v474_v19 = vsel %vm3503_vm6, %v467_v11, %v473_v25  ;;  %3102 = vmatprep.mubr.msk.bf16.mxu0 %vm608_vm8, %v551_v44  ;;  %v558_v57 = vrot.slane %v556_v48, 1  ;;  %3119 = vmatpush3.bf16.msra.mxu1 %v751_v40  ;;  %v594_v61 = vor.u32 %v592_v37, %v590_v47  ;;  %v1212_v32 = vld [vmem:[#allocation2 + $0x8] sm:$0xf]  ;;  %v3654_v11 = vld [vmem:[#allocation2 + $0x10] sm:$0xff]  }
  0xac   : > { %v391_v52 = vsel %vm3499_vm5, %v386_v12, %v390_v27  ;;  %v394_v53 = vsel %vm3503_vm6, %v387_v43, %v393_v28  ;;  %v3586_v54 = vld [vmem:[#allocation2 + $0x38] sm:$0xff]   ;;  %472 = vst [vmem:[#allocation2 + $0x40] sm:$0xf] %v471_v51  ;;  %475 = vst [vmem:[#allocation2 + $0x44] sm:$0x1] %v474_v19  ;;  %3268 = vmatprep.subr.msk.bf16.mxu1 %vm633_vm1, %v2845_v50  ;;  %v560_v4 = vshrl.u32 %v3567_v39, 16 }
  0xad   : > { %392 = vst [vmem:[#allocation2 + $0x18] sm:$0xf] %v391_v52  ;;  %395 = vst [vmem:[#allocation2 + $0x1c] sm:$0x1] %v394_v53  ;;  %v596_v58 = vshll.u32 %v3586_v54, 16  ;;  %v559_v59 = vsel %vm539_vm7, %v554_v55, %v558_v57  ;;  %v600_v6 = vshrl.u32 %v3586_v54, 16  ;;  %v859_v25 = vsel %vm856_vm9, %v857_v22, %v858_v17 }
  0xae   : > { %3103 = vmatmul.mubr.msk.bf16.vlgmr.msra.gmra.mxu0 %vm608_vm8, %v559_v59  ;;  %v562_v15 = vor.u32 %v560_v4, %v558_v57  ;;  %v860_v26 = vrot.slane %v3567_v39, 1  ;;  %v1097_v27 = vsel %vm633_vm1, %v2845_v50, 0  ;;  %v866_v31 = vrot.slane %v3537_v46, 1  ;;  %v3294_v19 = vld [vmem:[#allocation2 + $0x8] sm:$0xff]   ;;  %v3671_v52 = vld [vmem:[#allocation2 + $0x20] sm:$0xff]  }
  0xaf   : > { %v598_v62 = vrot.slane %v596_v58, 1  ;;  %3137 = vmatpush3.bf16.msra.mxu0 %v899_v38  ;;  %v868_v40 = vrot.slane %v3564_v30, 1  ;;  %v870_v42 = vrot.slane %v3586_v54, 1  ;;  %v1282_v45 = vshll.u32 %v3654_v11, 16  ;;  %v3680_v58 = vld [vmem:[#allocation2 + $0x28] sm:$0xff]   ;;  %v3297_v38 = vld [vmem:[#allocation2 + $0x10] sm:$0xff]  }
  0xb0   : > { %3269 = vmatprep.subr.msk.bf16.mxu0 %vm633_vm1, %v2862_v60  ;;  %v1298_v37 = vshll.u32 %v3671_v52, 16  ;;  %v1530_v59 = vsel %vm633_vm1, %v2880_v29, 0  ;;  %v1306_v3 = vshll.u32 %v3680_v58, 16  ;;  %v1310_v22 = vshrl.u32 %v3680_v58, 16 }
  0xb1   : > { %v599_v63 = vsel %vm539_vm7, %v594_v61, %v598_v62  ;;  %v602_v16 = vor.u32 %v600_v6, %v598_v62  ;;  %v871_v43 = vsel %vm856_vm9, %v868_v40, %v870_v42  ;;  %v1284_v51 = vrot.slane %v1282_v45, 1  ;;  %v3684_v61 = vld [vmem:[#allocation2 + $0x30] sm:$0xff]  }
  0xb2   : > { %3114 = vmatprep.mubr.msk.bf16.mxu1 %vm608_vm8, %v599_v63 }
  0xb3   : > { %v3603_v2 = vld [vmem:[#allocation2 + $0x40] ss:$0 sps:$4 sm:$0x11]  }
  0xb4   : > { %v3291_v20 = vld [vmem:[#allocation2 + $0x18] sm:$0xff]   ;;  %v604_v7 = vshll.u32 %v3603_v2, 16  ;;  %v872_v50 = vrot.slane %v3603_v2, 1  ;;  %v1300_v2 = vrot.slane %v1298_v37, 1  ;;  %v3309_v45 = vld [vmem:[#allocation2 + $0x40] sm:$0xff]  }
  0xb5   : > { %v564_v5 = vshll.u32 %v3291_v20, 16  ;;  %v568_v14 = vshrl.u32 %v3291_v20, 16  ;;  %v862_v28 = vrot.slane %v3291_v20, 1  ;;  %v3664_v47 = vld [vmem:[#allocation2 + $0x18] sm:$0xff]  }
  0xb6   : > { %v606_v21 = vrot.slane %v604_v7, 1  ;;  %v873_v53 = vsel %vm856_vm9, %v870_v42, %v872_v50  ;;  %v1294_v57 = vshrl.u32 %v3664_v47, 16  ;;  %v3298_v63 = vld [vmem:[#allocation2 + $0x18] sm:$0xff]   ;;  %v1314_v7 = vshll.u32 %v3684_v61, 16 }
  0xb7   : > { %v566_v13 = vrot.slane %v564_v5, 1  ;;  %v863_v10 = vsel %vm856_vm9, %v860_v26, %v862_v28  ;;  %v3699_v5 = vld [vmem:[%s4042_s1 + $0x10] sm:$0x3] }
  0xb8   : > { %v607_v36 = vsel %vm539_vm7, %v602_v16, %v606_v21  ;;  %v3301_v21 = vld [vmem:[#allocation2 + $0x20] sm:$0xff]  }
  0xb9   : > { %v567_v18 = vsel %vm539_vm7, %v562_v15, %v566_v13  ;;  %v570_v24 = vor.u32 %v568_v14, %v566_v13  ;;  %3115 = vmatmul.mubr.msk.bf16.gmra.mxu1 %vm608_vm8, %v607_v36  ;;  %v1302_v15 = vshrl.u32 %v3671_v52, 16  ;;  %v1308_v13 = vrot.slane %v1306_v3, 1  ;;  %v3708_v14 = vld [vmem:[#allocation2 + $0x38] sm:$0xff]  }
  0xba   : > { %3106 = vmatprep.mubr.msk.bf16.mxu0 %vm608_vm8, %v567_v18  ;;  %3120 = vmatprep.mubr.msk.bf16.mxu1 %vm608_vm8, %v3508_v49  ;;  %v861_v49 = vsel %vm856_vm9, %v858_v17, %v860_v26  ;;  %v1316_v17 = vrot.slane %v1314_v7, 1  ;;  %v3713_v18 = vld [vmem:[#allocation2 + $0x40] sm:$0xff]  }
  0xbb   : > { %v575_v8 = vsel %vm539_vm7, %v570_v24, %v3548_v0  ;;  %v1367_v0 = vsel %vm633_vm1, %v2862_v60, 0  ;;  %v1304_v16 = vor.u32 %v1302_v15, %v1300_v2  ;;  %v3302_v24 = vld [vmem:[#allocation2 + $0x28] sm:$0xff]   ;;  %v1312_v36 = vor.u32 %v1310_v22, %v1308_v13  ;;  %v3318_v7 = vld [vmem:[#allocation2 + $0x40] sm:$0xff]   ;;  %v2113_v15 = vld [vmem:[#allocation2 + $0x10] sm:$0xe] }
  0xbc   : > { %3107 = vmatmul.mubr.msk.bf16.gmra.mxu0 %vm608_vm8, %v575_v8  ;;  %v1322_v8 = vshll.u32 %v3708_v14, 16 }
  0xbd   : > { %3138 = vmatprep.mubr.msk.bf16.mxu0 %vm608_vm8, %v859_v25  ;;  %v1309_v25 = vsel %vm539_vm7, %v1304_v16, %v1308_v13  ;;  %v1317_v26 = vsel %vm539_vm7, %v1312_v36, %v1316_v17 }
  0xc1   : > { %3121 = vmatmul.mubr.msk.bf16.vlgmr.msra.gmra.mxu1 %vm608_vm8, %v3559_v23  ;;  %v864_v23 = vrot.slane %v3527_v41, 1 }
  0xc2   : > { %3155 = vmatpush3.bf16.msra.mxu1 %v1097_v27  ;;  %3124 = vmatprep.mubr.msk.bf16.mxu1 %vm608_vm8, %v3567_v39  ;;  %v2863_v39 = vcombine.low %v1212_v32, %v3642_v33  ;;  %v1330_v27 = vshll.u32 %v3713_v18, 16  ;;  %v3725_v32 = vld [vmem:[#allocation2 + $0x48] ss:$0 sps:$4 sm:$0x11]  }
  0xc3   : > { %3270 = vmatprep.subr.msk.bf16.mxu1 %vm633_vm1, %v2880_v29  ;;  %v865_v34 = vsel %vm856_vm9, %v862_v28, %v864_v23  ;;  %v867_v35 = vsel %vm856_vm9, %v864_v23, %v866_v31  ;;  %v1324_v28 = vrot.slane %v1322_v8, 1  ;;  %v1318_v29 = vshrl.u32 %v3684_v61, 16  ;;  %v3324_v8 = vld [vmem:[#allocation2 + $0x28] sm:$0xff]  }
  0xc4   : > { %3139 = vmatmul.mubr.msk.bf16.vlgmr.msra.gmra.mxu0 %vm608_vm8, %v861_v49  ;;  %v1277_v12 = vshll.u32 %v2863_v39, 16  ;;  %v1275_v48 = vshrl.u32 %v2863_v39, 16  ;;  %v1326_v49 = vshrl.u32 %v3708_v14, 16  ;;  %v1338_v39 = vshll.u32 %v3725_v32, 16 }
  0xc5   : > { %3173 = vmatpush3.bf16.msra.mxu0 %v1367_v0  ;;  %3142 = vmatprep.mubr.msk.bf16.mxu0 %vm608_vm8, %v863_v10  ;;  %v3305_v0 = vld [vmem:[#allocation2 + $0x30] sm:$0xff]   ;;  %v3306_v10 = vld [vmem:[#allocation2 + $0x38] sm:$0xff]   ;;  %v1320_v23 = vor.u32 %v1318_v29, %v1316_v17 }
  0xc6   : > { %3271 = vmatprep.subr.msk.bf16.mxu0 %vm633_vm1, %v2890_v9  ;;  %v1279_v44 = vrot.slane %v1277_v12, 1  ;;  %v1334_v12 = vshrl.u32 %v3713_v18, 16 }
  0xc9   : > { %3125 = vmatmul.mubr.msk.bf16.gmra.mxu1 %vm608_vm8, %v3291_v20  ;;  %v1728_v20 = vsel %vm633_vm1, %v2890_v9, 0  ;;  %v1332_v9 = vrot.slane %v1330_v27, 1 }
  0xca   : > { %3128 = vmatprep.mubr.msk.bf16.mxu1 %vm608_vm8, %v3527_v41  ;;  %v869_v41 = vsel %vm856_vm9, %v866_v31, %v868_v40  ;;  %v1482_v31 = vld [vmem:[#allocation2 + $0x8] sm:$0xe] }
  0xcb   : > { %v2881_v42 = vcombine.low %v1482_v31, %v3642_v33  ;;  %v1491_v33 = vrot.slane %v3664_v47, 1 }
  0xcc   : > { %3143 = vmatmul.mubr.msk.bf16.gmra.mxu0 %vm608_vm8, %v865_v34  ;;  %v1328_v34 = vor.u32 %v1326_v49, %v1324_v28 }
  0xcd   : > { %3146 = vmatprep.mubr.msk.bf16.mxu0 %vm608_vm8, %v867_v35  ;;  %v1325_v35 = vsel %vm539_vm7, %v1320_v23, %v1324_v28 }
  0xce   : > { %v1333_v40 = vsel %vm539_vm7, %v1328_v34, %v1332_v9 }
  0xd1   : > { %3129 = vmatmul.mubr.msk.bf16.gmra.mxu1 %vm608_vm8, %v3537_v46  ;;  %v1280_v46 = vor.u32 %v1279_v44, %v1275_v48  ;;  %v1340_v44 = vrot.slane %v1338_v39, 1  ;;  %v1488_v48 = vrot.slane %v2881_v42, 1  ;;  %v2124_v39 = vrot.slane %v3324_v8, 1 }
  0xd2   : > { %3132 = vmatprep.mubr.msk.bf16.mxu1 %vm608_vm8, %v3564_v30  ;;  %v1290_v30 = vshll.u32 %v3664_v47, 16  ;;  %v1495_v47 = vrot.slane %v3680_v58, 1  ;;  %v1499_v58 = vrot.slane %v3708_v14, 1  ;;  %v1503_v14 = vrot.slane %v3725_v32, 1  ;;  %v3326_v32 = vld [vmem:[#allocation2 + $0x38] sm:$0xff]  }
  0xd3   : > { %v1285_v55 = vsel %vm539_vm7, %v1280_v46, %v1284_v51 }
  0xd4   : > { %3147 = vmatmul.mubr.msk.bf16.gmra.mxu0 %vm608_vm8, %v869_v41  ;;  %v1292_v56 = vrot.slane %v1290_v30, 1  ;;  %v1489_v41 = vrot.slane %v3654_v11, 1  ;;  %v1493_v30 = vrot.slane %v3671_v52, 1  ;;  %v1497_v52 = vrot.slane %v3684_v61, 1 }
  0xd5   : > { %3150 = vmatprep.mubr.msk.bf16.mxu0 %vm608_vm8, %v871_v43  ;;  %v1336_v43 = vor.u32 %v1334_v12, %v1332_v9  ;;  %v1501_v61 = vrot.slane %v3713_v18, 1  ;;  %v1929_v9 = vshll.u32 %v3324_v8, 16 }
  0xd6   : > { %v1296_v60 = vor.u32 %v1294_v57, %v1292_v56  ;;  %v1490_v50 = vsel %vm856_vm9, %v1488_v48, %v1489_v41  ;;  %v3314_v57 = vld [vmem:[#allocation2 + $0x20] sm:$0xff]   ;;  %v1496_v37 = vsel %vm856_vm9, %v1493_v30, %v1495_v47 }
  0xd7   : > { %v1341_v46 = vsel %vm539_vm7, %v1336_v43, %v1340_v44  ;;  %v1502_v3 = vsel %vm856_vm9, %v1499_v58, %v1501_v61  ;;  %v1931_v34 = vrot.slane %v1929_v9, 1  ;;  %v3327_v43 = vld [vmem:[#allocation2 + $0x40] sm:$0xff]  }
  0xd8   : > { %v1301_v6 = vsel %vm539_vm7, %v1296_v60, %v1300_v2  ;;  %v3315_v60 = vld [vmem:[#allocation2 + $0x28] sm:$0xff]   ;;  %v1500_v2 = vsel %vm856_vm9, %v1497_v52, %v1499_v58 }
  0xd9   : > { %3133 = vmatmul.mubr.msk.bf16.gmra.mxu1 %vm608_vm8, %v3586_v54  ;;  %v1286_v54 = vshrl.u32 %v3654_v11, 16  ;;  %v1998_v11 = vsel %vm633_vm1, %v3689_v1, 0 }
  0xda   : > { %3156 = vmatprep.mubr.msk.bf16.mxu1 %vm608_vm8, %v3294_v19  ;;  %v1492_v19 = vsel %vm856_vm9, %v1489_v41, %v1491_v33  ;;  %v1945_v41 = vshll.u32 %v3326_v32, 16 }
  0xdb   : > { %v1288_v62 = vor.u32 %v1286_v54, %v1284_v51  ;;  %v3312_v51 = vld [vmem:[#allocation2 + $0x10] sm:$0xff]  }
  0xdc   : > { %3151 = vmatmul.mubr.msk.bf16.gmra.mxu0 %vm608_vm8, %v873_v53  ;;  %v1494_v53 = vsel %vm856_vm9, %v1491_v33, %v1493_v30  ;;  %v1843_v54 = vld [vmem:[#allocation2 + $0x10] sm:$0xf]  ;;  %v1953_v33 = vshll.u32 %v3327_v43, 16 }
  0xdd   : > { %3174 = vmatprep.mubr.msk.bf16.mxu0 %vm608_vm8, %v1285_v55  ;;  %v1293_v4 = vsel %vm539_vm7, %v1288_v62, %v1292_v56  ;;  %v3313_v55 = vld [vmem:[#allocation2 + $0x18] sm:$0xff]   ;;  %v2161_v56 = vsel %vm633_vm1, %v3699_v5, 0  ;;  %v3316_v62 = vld [vmem:[#allocation2 + $0x30] sm:$0xff]  }
  0xe1   : > { %3157 = vmatmul.mubr.msk.bf16.vlgmr.msra.gmra.mxu1 %vm608_vm8, %v3297_v38  ;;  %v1844_v38 = vld [vmem:[#allocation2 + $0x14] sm:$0xf] }
  0xe2   : > { %3191 = vmatpush3.bf16.msra.mxu1 %v1530_v59  ;;  %3160 = vmatprep.mubr.msk.bf16.mxu1 %vm608_vm8, %v3298_v63  ;;  %v1498_v59 = vsel %vm856_vm9, %v1495_v47, %v1497_v52  ;;  %v2908_v63 = vcombine.low %v1843_v54, %v1844_v38  ;;  %v2926_v22 = vcombine.low %v2113_v15, %v1844_v38  ;;  %v1955_v47 = vrot.slane %v1953_v33, 1  ;;  %v3329_v54 = vld [vmem:[#allocation2 + $0x50] ss:$0 sps:$4 sm:$0x11]  }
  0xe3   : > { %3272 = vmatprep.subr.msk.bf16.mxu1 %vm633_vm1, %v3689_v1  ;;  %v3320_v1 = vld [vmem:[#allocation2 + $0x18] sm:$0xff]  }
  0xe4   : > { %3175 = vmatmul.mubr.msk.bf16.vlgmr.msra.gmra.mxu0 %vm608_vm8, %v1293_v4  ;;  %v3317_v4 = vld [vmem:[#allocation2 + $0x38] sm:$0xff]   ;;  %v1906_v16 = vshrl.u32 %v2908_v63, 16  ;;  %v2120_v36 = vrot.slane %v3320_v1, 1  ;;  %v2119_v27 = vrot.slane %v2926_v22, 1  ;;  %v1917_v29 = vshrl.u32 %v3320_v1, 16 }
  0xe5   : > { %3209 = vmatpush3.bf16.msra.mxu0 %v1728_v20  ;;  %3178 = vmatprep.mubr.msk.bf16.mxu0 %vm608_vm8, %v1301_v6  ;;  %v1908_v20 = vshll.u32 %v2908_v63, 16  ;;  %v3323_v6 = vld [vmem:[#allocation2 + $0x20] sm:$0xff]  }
  0xe6   : > { %3273 = vmatprep.subr.msk.bf16.mxu0 %vm633_vm1, %v3699_v5  ;;  %v1913_v5 = vshll.u32 %v3320_v1, 16  ;;  %v1921_v17 = vshll.u32 %v3323_v6, 16  ;;  %v1925_v49 = vshrl.u32 %v3323_v6, 16 }
  0xe7   : > { %v1910_v13 = vrot.slane %v1908_v20, 1  ;;  %v1969_v20 = vshll.u32 %v3329_v54, 16 }
  0xe8   : > { %v1923_v28 = vrot.slane %v1921_v17, 1 }
  0xe9   : > { %3161 = vmatmul.mubr.msk.bf16.gmra.mxu1 %vm608_vm8, %v3301_v21  ;;  %v1915_v21 = vrot.slane %v1913_v5, 1  ;;  %v1911_v18 = vor.u32 %v1910_v13, %v1906_v16  ;;  %v2134_v13 = vrot.slane %v3329_v54, 1 }
  0xea   : > { %3164 = vmatprep.mubr.msk.bf16.mxu1 %vm608_vm8, %v3302_v24  ;;  %v3321_v24 = vld [vmem:[#allocation2 + $0x48] sm:$0xff]   ;;  %v1927_v31 = vor.u32 %v1925_v49, %v1923_v28 }
  0xeb   : > { %v1919_v23 = vor.u32 %v1917_v29, %v1915_v21 }
  0xec   : > { %3179 = vmatmul.mubr.msk.bf16.gmra.mxu0 %vm608_vm8, %v1309_v25  ;;  %v1504_v25 = vsel %vm856_vm9, %v1501_v61, %v1503_v14  ;;  %v1932_v12 = vsel %vm539_vm7, %v1927_v31, %v1931_v34  ;;  %v2130_v61 = vrot.slane %v3327_v43, 1 }
  0xed   : > { %3182 = vmatprep.mubr.msk.bf16.mxu0 %vm608_vm8, %v1317_v26  ;;  %v1916_v26 = vsel %vm539_vm7, %v1911_v18, %v1915_v21  ;;  %v1924_v42 = vsel %vm539_vm7, %v1919_v23, %v1923_v28 }
  0xf1   : > { %3165 = vmatmul.mubr.msk.bf16.gmra.mxu1 %vm608_vm8, %v3305_v0  ;;  %v2121_v0 = vsel %vm856_vm9, %v2119_v27, %v2120_v36 }
  0xf2   : > { %3168 = vmatprep.mubr.msk.bf16.mxu1 %vm608_vm8, %v3306_v10  ;;  %v3325_v10 = vld [vmem:[#allocation2 + $0x30] sm:$0xff]  }
  0xf3   : > { %v2126_v30 = vrot.slane %v3325_v10, 1 }
  0xf4   : > { %3183 = vmatmul.mubr.msk.bf16.gmra.mxu0 %vm608_vm8, %v1325_v35  ;;  %v2122_v35 = vrot.slane %v3323_v6, 1 }
  0xf5   : > { %3186 = vmatprep.mubr.msk.bf16.mxu0 %vm608_vm8, %v1333_v40  ;;  %v1937_v40 = vshll.u32 %v3325_v10, 16 }
  0xf6   : > { %v2123_v44 = vsel %vm856_vm9, %v2120_v36, %v2122_v35 }
  0xf7   : > { %v1939_v48 = vrot.slane %v1937_v40, 1 }
  0xf9   : > { %3169 = vmatmul.mubr.msk.bf16.gmra.mxu1 %vm608_vm8, %v3309_v45  ;;  %v2125_v45 = vsel %vm856_vm9, %v2122_v35, %v2124_v39 }
  0xfa   : > { %3192 = vmatprep.mubr.msk.bf16.mxu1 %vm608_vm8, %v1490_v50  ;;  %v1933_v50 = vshrl.u32 %v3324_v8, 16 }
  0xfc   : > { %3187 = vmatmul.mubr.msk.bf16.gmra.mxu0 %vm608_vm8, %v1341_v46  ;;  %v1941_v46 = vshrl.u32 %v3325_v10, 16 }
  0xfd   : > { %3210 = vmatprep.mubr.msk.bf16.mxu0 %vm608_vm8, %v3312_v51  ;;  %v1947_v51 = vrot.slane %v1945_v41, 1 }
 0x101   : > { %3193 = vmatmul.mubr.msk.bf16.vlgmr.msra.gmra.mxu1 %vm608_vm8, %v1492_v19  ;;  %v1943_v19 = vor.u32 %v1941_v46, %v1939_v48 }
 0x102   : > { %3227 = vmatpush3.bf16.msra.mxu1 %v1998_v11  ;;  %3196 = vmatprep.mubr.msk.bf16.mxu1 %vm608_vm8, %v1494_v53  ;;  %v1935_v11 = vor.u32 %v1933_v50, %v1931_v34  ;;  %v2128_v53 = vrot.slane %v3326_v32, 1 }
 0x104   : > { %3211 = vmatmul.mubr.msk.bf16.vlgmr.msra.gmra.mxu0 %vm608_vm8, %v3313_v55  ;;  %v3328_v55 = vld [vmem:[#allocation2 + $0x48] sm:$0xff]   ;;  %v2129_v38 = vsel %vm856_vm9, %v2126_v30, %v2128_v53  ;;  %v2131_v5 = vsel %vm856_vm9, %v2128_v53, %v2130_v61 }
 0x105   : > { %3245 = vmatpush3.bf16.msra.mxu0 %v2161_v56  ;;  %3214 = vmatprep.mubr.msk.bf16.mxu0 %vm608_vm8, %v3314_v57  ;;  %v1940_v56 = vsel %vm539_vm7, %v1935_v11, %v1939_v48  ;;  %v1948_v57 = vsel %vm539_vm7, %v1943_v19, %v1947_v51  ;;  %v1961_v52 = vshll.u32 %v3328_v55, 16  ;;  %v1965_v1 = vshrl.u32 %v3328_v55, 16 }
 0x107   : > { %v1963_v63 = vrot.slane %v1961_v52, 1 }
 0x109   : > { %3197 = vmatmul.mubr.msk.bf16.gmra.mxu1 %vm608_vm8, %v1496_v37  ;;  %v2127_v37 = vsel %vm856_vm9, %v2124_v39, %v2126_v30  ;;  %v1967_v6 = vor.u32 %v1965_v1, %v1963_v63 }
 0x10a   : > { %3200 = vmatprep.mubr.msk.bf16.mxu1 %vm608_vm8, %v1498_v59  ;;  %v1957_v59 = vshrl.u32 %v3327_v43, 16 }
 0x10c   : > { %3215 = vmatmul.mubr.msk.bf16.gmra.mxu0 %vm608_vm8, %v3315_v60  ;;  %v1949_v60 = vshrl.u32 %v3326_v32, 16 }
 0x10d   : > { %3218 = vmatprep.mubr.msk.bf16.mxu0 %vm608_vm8, %v3316_v62  ;;  %v1959_v62 = vor.u32 %v1957_v59, %v1955_v47 }
 0x10e   : > { %v1951_v58 = vor.u32 %v1949_v60, %v1947_v51 }
 0x111   : > { %3201 = vmatmul.mubr.msk.bf16.gmra.mxu1 %vm608_vm8, %v1500_v2  ;;  %v2132_v2 = vrot.slane %v3328_v55, 1 }
 0x112   : > { %3204 = vmatprep.mubr.msk.bf16.mxu1 %vm608_vm8, %v1502_v3  ;;  %v1956_v3 = vsel %vm539_vm7, %v1951_v58, %v1955_v47 }
 0x113   : > { %v2133_v15 = vsel %vm856_vm9, %v2130_v61, %v2132_v2  ;;  %v2135_v16 = vsel %vm856_vm9, %v2132_v2, %v2134_v13 }
 0x114   : > { %3219 = vmatmul.mubr.msk.bf16.gmra.mxu0 %vm608_vm8, %v3317_v4  ;;  %v1964_v4 = vsel %vm539_vm7, %v1959_v62, %v1963_v63 }
 0x115   : > { %3222 = vmatprep.mubr.msk.bf16.mxu0 %vm608_vm8, %v3318_v7  ;;  %v1971_v7 = vrot.slane %v1969_v20, 1 }
 0x117   : > { %v1972_v14 = vsel %vm539_vm7, %v1967_v6, %v1971_v7 }
 0x119   : > { %3205 = vmatmul.mubr.msk.bf16.gmra.mxu1 %vm608_vm8, %v1504_v25 }
 0x11a   : > { %3228 = vmatprep.mubr.msk.bf16.mxu1 %vm608_vm8, %v1916_v26 }
 0x11c   : > { %3223 = vmatmul.mubr.msk.bf16.gmra.mxu0 %vm608_vm8, %v3321_v24 }
 0x11d   : > { %3246 = vmatprep.mubr.msk.bf16.mxu0 %vm608_vm8, %v2121_v0 }
 0x121   : > { %3229 = vmatmul.mubr.msk.bf16.vlgmr.msra.gmra.mxu1 %vm608_vm8, %v1924_v42 }
 0x122   : > { %3232 = vmatprep.mubr.msk.bf16.mxu1 %vm608_vm8, %v1932_v12 }
 0x124   : > { %3247 = vmatmul.mubr.msk.bf16.vlgmr.msra.gmra.mxu0 %vm608_vm8, %v2123_v44 }
 0x125   : > { %3250 = vmatprep.mubr.msk.bf16.mxu0 %vm608_vm8, %v2125_v45 }
 0x129   : > { %3233 = vmatmul.mubr.msk.bf16.gmra.mxu1 %vm608_vm8, %v1940_v56 }
 0x12a   : > { %3236 = vmatprep.mubr.msk.bf16.mxu1 %vm608_vm8, %v1948_v57 }
 0x12c   : > { %3251 = vmatmul.mubr.msk.bf16.gmra.mxu0 %vm608_vm8, %v2127_v37 }
 0x12d   : > { %3254 = vmatprep.mubr.msk.bf16.mxu0 %vm608_vm8, %v2129_v38 }
 0x131   : > { %3237 = vmatmul.mubr.msk.bf16.gmra.mxu1 %vm608_vm8, %v1956_v3 }
 0x132   : > { %3240 = vmatprep.mubr.msk.bf16.mxu1 %vm608_vm8, %v1964_v4 }
 0x134   : > { %3255 = vmatmul.mubr.msk.bf16.gmra.mxu0 %vm608_vm8, %v2131_v5 }
 0x135   : > { %3258 = vmatprep.mubr.msk.bf16.mxu0 %vm608_vm8, %v2133_v15 }
 0x139   : > { %3241 = vmatmul.mubr.msk.bf16.gmra.mxu1 %vm608_vm8, %v1972_v14 }
 0x13c   : > { %3259 = vmatmul.mubr.msk.bf16.gmra.mxu0 %vm608_vm8, %v2135_v16 }
 0x16a   : > { %v3112_v21 = vpop.f32.mrf.mxu1 }
 0x16c   : > { %v703_v17 = vpop.f32.mrf.mxu1 }
 0x16e   : > { %v3104_v22 = vpop.f32.mrf.mxu0  ;;  %v3113_v24 = vpop.f32.mrf.mxu1 }
 0x170   : > { %v671_v18 = vpop.f32.mrf.mxu0  ;;  %v706_v8 = vpop.f32.mrf.mxu1 }
 0x172   : > { %v3105_v36 = vpop.f32.mrf.mxu0 }
 0x174   : > { %v674_v25 = vpop.f32.mrf.mxu0 }
 0x179   : > { %v3116_v26 = vpop.f32.mrf.mxu1 }
 0x17b   : > { %v719_v28 = vpop.f32.mrf.mxu1 }
 0x17c   : > { %v3108_v27 = vpop.f32.mrf.mxu0 }
 0x17d   : > { %v3117_v0 = vpop.f32.mrf.mxu1 }
 0x17e   : > { %v687_v29 = vpop.f32.mrf.mxu0 }
 0x17f   : > { %v722_v9 = vpop.f32.mrf.mxu1 }
 0x180   : > { %v3109_v49 = vpop.f32.mrf.mxu0 }
 0x181   : > { %v3122_v23 = vpop.f32.mrf.mxu1 }
 0x182   : > { %v690_v10 = vpop.f32.mrf.mxu0  ;;  %v796_v31 = vadd.f32 %v3122_v23, %v3104_v22 }
 0x183   : > { %v787_v32 = vpop.f32.mrf.mxu1 }
 0x184   : > { %v3140_v34 = vpop.f32.mrf.mxu0  ;;  %v788_v35 = vadd.f32 %v787_v32, %v671_v18 }
 0x185   : > { %v3807_v39 = vadd.f32 %v3140_v34, %v796_v31  ;;  %v3123_v40 = vpop.f32.mrf.mxu1 }
 0x186   : > { %v935_v42 = vpop.f32.mrf.mxu0  ;;  %v799_v12 = vadd.f32 %v3123_v40, %v3105_v36 }
 0x187   : > { %v3809_v41 = vadd.f32 %v935_v42, %v788_v35  ;;  %v790_v43 = vpop.f32.mrf.mxu1 }
 0x188   : > { %v3141_v44 = vpop.f32.mrf.mxu0  ;;  %v791_v45 = vadd.f32 %v790_v43, %v674_v25 }
 0x189   : > { %v3811_v48 = vadd.f32 %v3141_v44, %v799_v12  ;;  %v3126_v50 = vpop.f32.mrf.mxu1 }
 0x18a   : > { %v938_v46 = vpop.f32.mrf.mxu0  ;;  %v812_v51 = vadd.f32 %v3126_v50, %v3108_v27 }
 0x18b   : > { %v3813_v33 = vadd.f32 %v938_v46, %v791_v45  ;;  %v803_v11 = vpop.f32.mrf.mxu1 }
 0x18c   : > { %v3144_v30 = vpop.f32.mrf.mxu0  ;;  %v804_v19 = vadd.f32 %v803_v11, %v687_v29 }
 0x18d   : > { %v3815_v53 = vadd.f32 %v3144_v30, %v812_v51  ;;  %v3127_v55 = vpop.f32.mrf.mxu1 }
 0x18e   : > { %v951_v56 = vpop.f32.mrf.mxu0  ;;  %v815_v57 = vadd.f32 %v3127_v55, %v3109_v49 }
 0x18f   : > { %v3817_v47 = vadd.f32 %v951_v56, %v804_v19  ;;  %v806_v52 = vpop.f32.mrf.mxu1 }
 0x190   : > { %v3145_v37 = vpop.f32.mrf.mxu0  ;;  %v807_v54 = vadd.f32 %v806_v52, %v690_v10 }
 0x191   : > { %v3819_v38 = vadd.f32 %v3145_v37, %v815_v57  ;;  %v3130_v59 = vpop.f32.mrf.mxu1 }
 0x192   : > { %v954_v60 = vpop.f32.mrf.mxu0  ;;  %v828_v62 = vadd.f32 %v3130_v59, %v3112_v21 }
 0x193   : > { %v3821_v63 = vadd.f32 %v954_v60, %v807_v54  ;;  %v819_v58 = vpop.f32.mrf.mxu1 }
 0x194   : > { %v3148_v61 = vpop.f32.mrf.mxu0  ;;  %v820_v1 = vadd.f32 %v819_v58, %v703_v17 }
 0x195   : > { %v3823_v20 = vadd.f32 %v3148_v61, %v828_v62  ;;  %v3131_v2 = vpop.f32.mrf.mxu1 }
 0x196   : > { %v967_v3 = vpop.f32.mrf.mxu0  ;;  %v831_v4 = vadd.f32 %v3131_v2, %v3113_v24 }
 0x197   : > { %v3825_v5 = vadd.f32 %v967_v3, %v820_v1  ;;  %v822_v6 = vpop.f32.mrf.mxu1 }
 0x198   : > { %v3149_v7 = vpop.f32.mrf.mxu0  ;;  %v823_v15 = vadd.f32 %v822_v6, %v706_v8 }
 0x199   : > { %v3827_v13 = vadd.f32 %v3149_v7, %v831_v4  ;;  %v3134_v14 = vpop.f32.mrf.mxu1 }
 0x19a   : > { %v970_v16 = vpop.f32.mrf.mxu0  ;;  %v844_v21 = vadd.f32 %v3134_v14, %v3116_v26 }
 0x19b   : > { %v3829_v22 = vadd.f32 %v970_v16, %v823_v15  ;;  %v835_v18 = vpop.f32.mrf.mxu1 }
 0x19c   : > { %v3152_v36 = vpop.f32.mrf.mxu0  ;;  %v836_v17 = vadd.f32 %v835_v18, %v719_v28 }
 0x19d   : > { %v3831_v25 = vadd.f32 %v3152_v36, %v844_v21  ;;  %v3135_v27 = vpop.f32.mrf.mxu1 }
 0x19e   : > { %v983_v29 = vpop.f32.mrf.mxu0  ;;  %v847_v24 = vadd.f32 %v3135_v27, %v3117_v0 }
 0x19f   : > { %v3833_v49 = vadd.f32 %v983_v29, %v836_v17  ;;  %v838_v10 = vpop.f32.mrf.mxu1 }
 0x1a0   : > { %v3153_v23 = vpop.f32.mrf.mxu0  ;;  %v839_v8 = vadd.f32 %v838_v10, %v722_v9 }
 0x1a1   : > { %4051 = vst [vmem:[#allocation3_spill] sm:$0xff] %v3833_v49  ;;  %v3835_v31 = vadd.f32 %v3153_v23, %v847_v24  ;;  %v3158_v34 = vpop.f32.mrf.mxu1 }
 0x1a2   : > { %v986_v32 = vpop.f32.mrf.mxu0 }
 0x1a3   : > { %4052 = vst [vmem:[#allocation4_spill] sm:$0xff] %v3835_v31  ;;  %v3837_v26 = vadd.f32 %v986_v32, %v839_v8  ;;  %v1133_v35 = vpop.f32.mrf.mxu1 }
 0x1a4   : > { %v3176_v40 = vpop.f32.mrf.mxu0 }
 0x1a5   : > { %4053 = vst [vmem:[#allocation5_spill] sm:$0xff] %v3837_v26  ;;  %v3159_v42 = vpop.f32.mrf.mxu1 }
 0x1a6   : > { %v1403_v28 = vpop.f32.mrf.mxu0 }
 0x1a7   : > { %v1136_v12 = vpop.f32.mrf.mxu1 }
 0x1a8   : > { %v3177_v43 = vpop.f32.mrf.mxu0 }
 0x1a9   : > { %v3162_v44 = vpop.f32.mrf.mxu1 }
 0x1aa   : > { %v3839_v45 = vpop.f32.mrf.mxu0 }
 0x1ab   : > { %v1149_v0 = vpop.f32.mrf.mxu1 }
 0x1ac   : > { %v3841_v50 = vpop.f32.mrf.mxu0 }
 0x1ad   : > { %v3843_v46 = vpop.f32.mrf.mxu1 }
 0x1ae   : > { %v3845_v9 = vpop.f32.mrf.mxu0 }
 0x1af   : > { %v3847_v51 = vpop.f32.mrf.mxu1 }
 0x1b0   : > { %v3849_v11 = vpop.f32.mrf.mxu0 }
 0x1b1   : > { %v3851_v30 = vpop.f32.mrf.mxu1 }
 0x1b2   : > { %v3853_v19 = vpop.f32.mrf.mxu0 }
 0x1b3   : > { %v3855_v55 = vpop.f32.mrf.mxu1 }
 0x1b4   : > { %v3857_v56 = vpop.f32.mrf.mxu0 }
 0x1b5   : > { %v3859_v57 = vpop.f32.mrf.mxu1 }
 0x1b6   : > { %v3861_v52 = vpop.f32.mrf.mxu0 }
 0x1b7   : > { %v3863_v37 = vpop.f32.mrf.mxu1 }
 0x1b8   : > { %v3865_v54 = vpop.f32.mrf.mxu0 }
 0x1b9   : > { %v3867_v59 = vpop.f32.mrf.mxu1 }
 0x1ba   : > { %v3869_v60 = vpop.f32.mrf.mxu0 }
 0x1bb   : > { %4054 = vst [vmem:[#allocation6_spill] sm:$0xff] %v3869_v60  ;;  %v3871_v62 = vpop.f32.mrf.mxu1 }
 0x1bc   : > { %4055 = vst [vmem:[#allocation7_spill] sm:$0xff] %v3871_v62  ;;  %v3873_v58 = vpop.f32.mrf.mxu0  ;;  %v1196_v62 = vadd.f32 %v1133_v35, %v3809_v41  ;;  %v1202_v35 = vadd.f32 %v3162_v44, %v3815_v53  ;;  %v1206_v53 = vadd.f32 %v3851_v30, %v3823_v20  ;;  %v3952_v20 = vld [vmem:[%s4043_s2] ss:$0 sm:$0xff] }
 0x1bd   : > { %4056 = vst [vmem:[#allocation8_spill] sm:$0xff] %v3873_v58  ;;  %v3875_v61 = vpop.f32.mrf.mxu1 }
 0x1be   : > { %4057 = vst [vmem:[#allocation9_spill] sm:$0xff] %v3875_v61  ;;  %v3877_v1 = vpop.f32.mrf.mxu0  ;;  %v1198_v61 = vadd.f32 %v3158_v34, %v3807_v39  ;;  %v1197_v39 = vadd.f32 %v1136_v12, %v3813_v33  ;;  %v1203_v33 = vadd.f32 %v3843_v46, %v3819_v38  ;;  %v1201_v12 = vadd.f32 %v3847_v51, %v3821_v63 }
 0x1bf   : > { %4058 = vst [vmem:[#allocation10_spill] sm:$0xff] %v3877_v1  ;;  %v3879_v2 = vpop.f32.mrf.mxu1  ;;  %v1472_v44 = vadd.f32 %v3841_v50, %v1202_v35  ;;  %v1204_v38 = vadd.f32 %v3855_v55, %v3825_v5  ;;  %v1476_v5 = vadd.f32 %v3857_v56, %v1206_v53  ;;  %v1210_v35 = vadd.f32 %v3867_v59, %v3831_v25 }
 0x1c0   : > { %4059 = vst [vmem:[#allocation11_spill] sm:$0xff] %v3879_v2  ;;  %v3881_v3 = vpop.f32.mrf.mxu0  ;;  %v1473_v50 = vadd.f32 %v3849_v11, %v1203_v33  ;;  %v1205_v11 = vadd.f32 %v3863_v37, %v3829_v22 }
 0x1c1   : > { %4060 = vst [vmem:[#allocation12_spill] sm:$0xff] %v3881_v3  ;;  %v3194_v6 = vpop.f32.mrf.mxu1 }
 0x1c2   : > { %v3883_v4 = vpop.f32.mrf.mxu0 }
 0x1c3   : > { %4061 = vst [vmem:[#allocation13_spill] sm:$0xff] %v3883_v4  ;;  %v1566_v7 = vpop.f32.mrf.mxu1 }
 0x1c4   : > { %v3212_v15 = vpop.f32.mrf.mxu0 }
 0x1c5   : > { %v3195_v14 = vpop.f32.mrf.mxu1 }
 0x1c6   : > { %v1764_v16 = vpop.f32.mrf.mxu0 }
 0x1c7   : > { %v1569_v21 = vpop.f32.mrf.mxu1 }
 0x1c8   : > { %v3213_v18 = vpop.f32.mrf.mxu0 }
 0x1c9   : > { %v3198_v36 = vpop.f32.mrf.mxu1 }
 0x1ca   : > { %v3885_v17 = vpop.f32.mrf.mxu0  ;;  %v1635_v30 = vadd.f32 %v3198_v36, %v1472_v44  ;;  %v1474_v36 = vadd.f32 %v3861_v52, %v1204_v38  ;;  %v4070_v44 = vld [vmem:[#allocation6_spill] sm:$0xff] }
 0x1cb   : > { %v1582_v27 = vpop.f32.mrf.mxu1 }
 0x1cc   : > { %v3887_v29 = vpop.f32.mrf.mxu0 }
 0x1cd   : > { %v3889_v24 = vpop.f32.mrf.mxu1 }
 0x1ce   : > { %v3891_v10 = vpop.f32.mrf.mxu0 }
 0x1cf   : > { %v3893_v23 = vpop.f32.mrf.mxu1 }
 0x1d0   : > { %v3895_v8 = vpop.f32.mrf.mxu0 }
 0x1d1   : > { %v3897_v32 = vpop.f32.mrf.mxu1 }
 0x1d2   : > { %v3899_v4 = vpop.f32.mrf.mxu0  ;;  %v1639_v33 = vadd.f32 %v3897_v32, %v1476_v5  ;;  %v4077_v5 = vld [vmem:[#allocation9_spill] sm:$0xff] }
 0x1d3   : > { %4062 = vst [vmem:[#allocation14_spill] sm:$0xff] %v3899_v4  ;;  %v3901_v3 = vpop.f32.mrf.mxu1  ;;  %v1468_v4 = vadd.f32 %v3176_v40, %v1198_v61  ;;  %v1200_v40 = vadd.f32 %v1149_v0, %v3817_v47  ;;  %v1467_v61 = vadd.f32 %v3839_v45, %v1197_v39  ;;  %v1833_v39 = vadd.f32 %v3887_v29, %v1635_v30 }
 0x1d4   : > { %4063 = vst [vmem:[#allocation15_spill] sm:$0xff] %v3901_v3  ;;  %v3903_v2 = vpop.f32.mrf.mxu0  ;;  %v1199_v3 = vadd.f32 %v3159_v42, %v3811_v48 }
 0x1d5   : > { %4064 = vst [vmem:[#allocation16_spill] sm:$0xff] %v3903_v2  ;;  %v3905_v26 = vpop.f32.mrf.mxu1  ;;  %v1631_v34 = vadd.f32 %v3194_v6, %v1468_v4  ;;  %v1630_v0 = vadd.f32 %v1569_v21, %v1467_v61 }
 0x1d6   : > { %4065 = vst [vmem:[#allocation17_spill] sm:$0xff] %v3905_v26  ;;  %v3907_v1 = vpop.f32.mrf.mxu0  ;;  %v1469_v41 = vadd.f32 %v3177_v43, %v1199_v3  ;;  %v1470_v3 = vadd.f32 %v3845_v9, %v1200_v40  ;;  %v1471_v9 = vadd.f32 %v3853_v19, %v1201_v12  ;;  %v1636_v19 = vadd.f32 %v3889_v24, %v1473_v50 }
 0x1d7   : > { %4066 = vst [vmem:[#allocation18_spill] sm:$0xff] %v3907_v1  ;;  %v3910_v31 = vpop.f32.mrf.mxu1  ;;  %v1466_v1 = vadd.f32 %v1403_v28, %v1196_v62  ;;  %v1829_v28 = vadd.f32 %v3212_v15, %v1631_v34  ;;  %v1828_v15 = vadd.f32 %v3885_v17, %v1630_v0  ;;  %v4072_v0 = vld [vmem:[#allocation7_spill] sm:$0xff] }
 0x1d8   : > { %4067 = vst [vmem:[#allocation19_spill] sm:$0xff] %v3910_v31  ;;  %v3912_v58 = vpop.f32.mrf.mxu0  ;;  %v1632_v62 = vadd.f32 %v3195_v14, %v1469_v41  ;;  %v1633_v55 = vadd.f32 %v1582_v27, %v1470_v3 }
 0x1d9   : > { %4068 = vst [vmem:[#allocation20_spill] sm:$0xff] %v3912_v58  ;;  %v3915_v49 = vpop.f32.mrf.mxu1 }
 0x1da   : > { %v3917_v60 = vpop.f32.mrf.mxu0  ;;  %v1830_v51 = vadd.f32 %v3213_v18, %v1632_v62  ;;  %v1207_v18 = vadd.f32 %v3859_v57, %v3827_v13  ;;  %v1831_v13 = vadd.f32 %v3891_v10, %v1633_v55  ;;  %v1634_v57 = vadd.f32 %v3893_v23, %v1471_v9  ;;  %v4075_v30 = vld [vmem:[#allocation14_spill] sm:$0xff]  ;;  %v4076_v9 = vld [vmem:[#allocation4_spill] sm:$0xff] }
 0x1db   : > { %4069 = vst [vmem:[#allocation21_spill] sm:$0xff] %v3917_v60  ;;  %v3920_v2 = vpop.f32.mrf.mxu1  ;;  %v1629_v60 = vadd.f32 %v1566_v7, %v1466_v1  ;;  %v1834_v62 = vadd.f32 %v3895_v8, %v1636_v19  ;;  %v1211_v55 = vadd.f32 %v4077_v5, %v4076_v9 }
 0x1dc   : > { %v3922_v26 = vpop.f32.mrf.mxu0 }
 0x1dd   : > { %v3925_v31 = vpop.f32.mrf.mxu1  ;;  %v1827_v45 = vadd.f32 %v1764_v16, %v1629_v60 }
 0x1de   : > { %v3927_v58 = vpop.f32.mrf.mxu0 }
 0x1df   : > { %v3931_v48 = vpop.f32.mrf.mxu1 }
 0x1e0   : > { %v3933_v42 = vpop.f32.mrf.mxu0 }
 0x1e1   : > { %v3230_v43 = vpop.f32.mrf.mxu1 }
 0x1e2   : > { %v3943_v47 = vpop.f32.mrf.mxu0  ;;  %v2099_v1 = vadd.f32 %v3230_v43, %v1829_v28  ;;  %v1477_v28 = vadd.f32 %v3865_v54, %v1207_v18  ;;  %v4071_v54 = vld [vmem:[#allocation3_spill] sm:$0xff]  ;;  %v4079_v18 = vld [vmem:[#allocation16_spill] sm:$0xff] }
 0x1e3   : > { %v2034_v46 = vpop.f32.mrf.mxu1  ;;  %v1208_v8 = vadd.f32 %v4072_v0, %v4071_v54  ;;  %v4086_v0 = vld [vmem:[#allocation12_spill] sm:$0xff] }
 0x1e4   : > { %v3248_v63 = vpop.f32.mrf.mxu0  ;;  %v2097_v4 = vadd.f32 %v2034_v46, %v1827_v45  ;;  %v1475_v45 = vadd.f32 %v4070_v44, %v1205_v11 }
 0x1e5   : > { %v2262_v6 = vadd.f32 %v3248_v63, %v2099_v1  ;;  %v3231_v60 = vpop.f32.mrf.mxu1  ;;  %v4073_v1 = vld [vmem:[#allocation15_spill] sm:$0xff]  ;;  %v4074_v63 = vld [vmem:[#allocation8_spill] sm:$0xff] }
 0x1e6   : > { %v2197_v7 = vpop.f32.mrf.mxu0  ;;  %v2100_v16 = vadd.f32 %v3231_v60, %v1830_v51  ;;  %v1637_v32 = vadd.f32 %v4073_v1, %v1474_v36  ;;  %v1480_v51 = vadd.f32 %v4074_v63, %v1210_v35  ;;  %v4078_v60 = vld [vmem:[#allocation17_spill] sm:$0xff]  ;;  %v1837_v36 = vadd.f32 %v4079_v18, %v1639_v33 }
 0x1e7   : > { %v2285_v14 = vadd.f32 %v3952_v20, %v2262_v6  ;;  %v2260_v21 = vadd.f32 %v2197_v7, %v2097_v4  ;;  %v2037_v56 = vpop.f32.mrf.mxu1  ;;  %v1832_v4 = vadd.f32 %v4075_v30, %v1634_v57  ;;  %v1640_v7 = vadd.f32 %v4078_v60, %v1477_v28 }
 0x1e8   : > { %v3249_v27 = vpop.f32.mrf.mxu0  ;;  %v2098_v34 = vadd.f32 %v2037_v56, %v1828_v15 }
 0x1e9   : > { %v2283_v17 = vadd.f32 %v3952_v20, %v2260_v21  ;;  %v2263_v41 = vadd.f32 %v3249_v27, %v2100_v16  ;;  %v2596_v52 = vmul.f32 %v2285_v14, %v2285_v14  ;;  %v3234_v22 = vpop.f32.mrf.mxu1  ;;  %v4080_v27 = vld [vmem:[#allocation10_spill] sm:$0xff] }
 0x1ea   : > { %v2200_v37 = vpop.f32.mrf.mxu0  ;;  %v2103_v29 = vadd.f32 %v3234_v22, %v1833_v39  ;;  %v1478_v39 = vadd.f32 %v4080_v27, %v1208_v8  ;;  %v1481_v8 = vadd.f32 %v4086_v0, %v1211_v55 }
 0x1eb   : > { %v2573_v24 = vadd.f32 %v2285_v14, %v2283_v17  ;;  %v2594_v40 = vmul.f32 %v2283_v17, %v2283_v17  ;;  %v2286_v61 = vadd.f32 %v3952_v20, %v2263_v41  ;;  %v2261_v25 = vadd.f32 %v2200_v37, %v2098_v34  ;;  %v2050_v59 = vpop.f32.mrf.mxu1  ;;  %v4081_v34 = vld [vmem:[#allocation5_spill] sm:$0xff]  ;;  %v4082_v41 = vld [vmem:[#allocation11_spill] sm:$0xff] }
 0x1ec   : > { %v3252_v10 = vpop.f32.mrf.mxu0  ;;  %v2101_v53 = vadd.f32 %v2050_v59, %v1831_v13  ;;  %v1209_v35 = vadd.f32 %v4082_v41, %v4081_v34  ;;  %v4083_v13 = vld [vmem:[#allocation18_spill] sm:$0xff] }
 0x1ed   : > { %v2611_v23 = vadd.f32 %v2596_v52, %v2594_v40  ;;  %v2980_v12 = vpack.c.bf16 %v2286_v61, %v2285_v14  ;;  %v2266_v43 = vadd.f32 %v3252_v10, %v2103_v29  ;;  %v2284_v3 = vadd.f32 %v3952_v20, %v2261_v25  ;;  %v3235_v38 = vpop.f32.mrf.mxu1  ;;  %v4084_v52 = vld [vmem:[#allocation19_spill] sm:$0xff] }
 0x1ee   : > { %v2213_v46 = vpop.f32.mrf.mxu0  ;;  %v2104_v6 = vadd.f32 %v3235_v38, %v1834_v62  ;;  %v1835_v57 = vadd.f32 %v4083_v13, %v1637_v32  ;;  %v1638_v22 = vadd.f32 %v4084_v52, %v1475_v45  ;;  %v4085_v62 = vld [vmem:[#allocation20_spill] sm:$0xff]  ;;  %v1643_v25 = vadd.f32 %v3915_v49, %v1480_v51 }
 0x1ef   : > { %3012 = vst [vmem:[%s3984_s23 + $0x8] sm:$0xff] %v2980_v12   ;;  %v2264_v50 = vadd.f32 %v2213_v46, %v2101_v53  ;;  %v2975_v15 = vpack.c.bf16 %v2284_v3, %v2283_v17  ;;  %v2289_v14 = vadd.f32 %v3952_v20, %v2266_v43  ;;  %v2053_v16 = vpop.f32.mrf.mxu1  ;;  %v1838_v33 = vadd.f32 %v4085_v62, %v1640_v7  ;;  %v4087_v46 = vld [vmem:[#allocation21_spill] sm:$0xff] }
 0x1f0   : > { %v3253_v21 = vpop.f32.mrf.mxu0  ;;  %v2102_v19 = vadd.f32 %v2053_v16, %v1832_v4  ;;  %v1836_v49 = vadd.f32 %v4087_v46, %v1638_v22  ;;  %v1841_v55 = vadd.f32 %v3922_v26, %v1643_v25 }
 0x1f1   : > { %v2287_v11 = vadd.f32 %v3952_v20, %v2264_v50  ;;  %v2267_v56 = vadd.f32 %v3253_v21, %v2104_v6  ;;  %2976 = vst [vmem:[%s3984_s23] sm:$0xff] %v2975_v15   ;;  %v3238_v17 = vpop.f32.mrf.mxu1  ;;  %v2600_v59 = vmul.f32 %v2289_v14, %v2289_v14  ;;  %v1644_v6 = vadd.f32 %v3925_v31, %v1481_v8 }
 0x1f2   : > { %v2216_v37 = vpop.f32.mrf.mxu0  ;;  %v2107_v28 = vadd.f32 %v3238_v17, %v1837_v36 }
 0x1f3   : > { %v2575_v40 = vadd.f32 %v2573_v24, %v2287_v11  ;;  %v2598_v61 = vmul.f32 %v2287_v11, %v2287_v11  ;;  %v2290_v29 = vadd.f32 %v3952_v20, %v2267_v56  ;;  %v2265_v10 = vadd.f32 %v2216_v37, %v2102_v19  ;;  %v2066_v12 = vpop.f32.mrf.mxu1 }
 0x1f4   : > { %v3256_v53 = vpop.f32.mrf.mxu0  ;;  %v2105_v45 = vadd.f32 %v2066_v12, %v1835_v57  ;;  %v1641_v24 = vadd.f32 %v3920_v2, %v1478_v39  ;;  %v1842_v56 = vadd.f32 %v3933_v42, %v1644_v6 }
 0x1f5   : > { %v2613_v43 = vadd.f32 %v2611_v23, %v2598_v61  ;;  %v2990_v44 = vpack.c.bf16 %v2290_v29, %v2289_v14  ;;  %v2270_v54 = vadd.f32 %v3256_v53, %v2107_v28  ;;  %v2288_v1 = vadd.f32 %v3952_v20, %v2265_v10  ;;  %v3239_v32 = vpop.f32.mrf.mxu1  ;;  %v4088_v23 = vld [vmem:[#allocation13_spill] sm:$0xff] }
 0x1f6   : > { %v2229_v3 = vpop.f32.mrf.mxu0  ;;  %v2577_v38 = vadd.f32 %v2575_v40, %v2289_v14  ;;  %v2108_v63 = vadd.f32 %v3239_v32, %v1838_v33  ;;  %v1479_v4 = vadd.f32 %v4088_v23, %v1209_v35  ;;  %v1839_v14 = vadd.f32 %v3927_v58, %v1641_v24 }
 0x1f7   : > { %3014 = vst [vmem:[%s3984_s23 + $0x18] sm:$0xff] %v2990_v44   ;;  %v2268_v51 = vadd.f32 %v2229_v3, %v2105_v45  ;;  %v2615_v30 = vadd.f32 %v2613_v43, %v2600_v59  ;;  %v2985_v50 = vpack.c.bf16 %v2288_v1, %v2287_v11  ;;  %v2293_v9 = vadd.f32 %v3952_v20, %v2270_v54  ;;  %v2069_v2 = vpop.f32.mrf.mxu1 }
 0x1f8   : > { %v3257_v5 = vpop.f32.mrf.mxu0  ;;  %v2106_v7 = vadd.f32 %v2069_v2, %v1836_v49  ;;  %v1642_v16 = vadd.f32 %v3931_v48, %v1479_v4 }
 0x1f9   : > { %v2291_v60 = vadd.f32 %v3952_v20, %v2268_v51  ;;  %v2271_v15 = vadd.f32 %v3257_v5, %v2108_v63  ;;  %3013 = vst [vmem:[%s3984_s23 + $0x10] sm:$0xff] %v2985_v50   ;;  %v3242_v21 = vpop.f32.mrf.mxu1  ;;  %v2604_v26 = vmul.f32 %v2293_v9, %v2293_v9 }
 0x1fa   : > { %v2232_v18 = vpop.f32.mrf.mxu0  ;;  %v2111_v19 = vadd.f32 %v3242_v21, %v1841_v55  ;;  %v1840_v17 = vadd.f32 %v3943_v47, %v1642_v16 }
 0x1fb   : > { %v2579_v36 = vadd.f32 %v2577_v38, %v2291_v60  ;;  %v2602_v31 = vmul.f32 %v2291_v60, %v2291_v60  ;;  %v2294_v11 = vadd.f32 %v3952_v20, %v2271_v15  ;;  %v2269_v27 = vadd.f32 %v2232_v18, %v2106_v7  ;;  %v2082_v39 = vpop.f32.mrf.mxu1 }
 0x1fc   : > { %v3260_v34 = vpop.f32.mrf.mxu0  ;;  %v2109_v58 = vadd.f32 %v2082_v39, %v1839_v14 }
 0x1fd   : > { %v2617_v41 = vadd.f32 %v2615_v30, %v2602_v31  ;;  %v3000_v35 = vpack.c.bf16 %v2294_v11, %v2293_v9  ;;  %v2274_v13 = vadd.f32 %v3260_v34, %v2111_v19  ;;  %v2292_v48 = vadd.f32 %v3952_v20, %v2269_v27  ;;  %v3243_v57 = vpop.f32.mrf.mxu1 }
 0x1fe   : > { %v2245_v52 = vpop.f32.mrf.mxu0  ;;  %v2581_v22 = vadd.f32 %v2579_v36, %v2293_v9  ;;  %v2112_v37 = vadd.f32 %v3243_v57, %v1842_v56 }
 0x1ff   : > { %3016 = vst [vmem:[%s3984_s23 + $0x28] sm:$0xff] %v3000_v35   ;;  %v2272_v40 = vadd.f32 %v2245_v52, %v2109_v58  ;;  %v2619_v42 = vadd.f32 %v2617_v41, %v2604_v26  ;;  %v2995_v61 = vpack.c.bf16 %v2292_v48, %v2291_v60  ;;  %v2297_v29 = vadd.f32 %v3952_v20, %v2274_v13  ;;  %v2085_v28 = vpop.f32.mrf.mxu1 }
 0x200   : > { %v3261_v62 = vpop.f32.mrf.mxu0  ;;  %v2110_v25 = vadd.f32 %v2085_v28, %v1840_v17 }
 0x201   : > { %v2295_v33 = vadd.f32 %v3952_v20, %v2272_v40  ;;  %v2275_v59 = vadd.f32 %v3261_v62, %v2112_v37  ;;  %3015 = vst [vmem:[%s3984_s23 + $0x20] sm:$0xff] %v2995_v61   ;;  %v2608_v44 = vmul.f32 %v2297_v29, %v2297_v29 }
 0x202   : > { %v2248_v10 = vpop.f32.mrf.mxu0 }
 0x203   : > { %v2583_v12 = vadd.f32 %v2581_v22, %v2295_v33  ;;  %v2606_v53 = vmul.f32 %v2295_v33, %v2295_v33  ;;  %v2298_v47 = vadd.f32 %v3952_v20, %v2275_v59  ;;  %v2273_v43 = vadd.f32 %v2248_v10, %v2110_v25 }
 0x205   : > { %v2585_v45 = vadd.f32 %v2583_v12, %v2297_v29  ;;  %v2621_v54 = vadd.f32 %v2619_v42, %v2606_v53  ;;  %v3010_v0 = vpack.c.bf16 %v2298_v47, %v2297_v29  ;;  %v2296_v8 = vadd.f32 %v3952_v20, %v2273_v43 }
 0x207   : > { %v2587_v24 = vrot.slane %v2585_v45, 4  ;;  %v2623_v1 = vadd.f32 %v2621_v54, %v2608_v44  ;;  %3018 = vst [vmem:[%s3984_s23 + $0x38] sm:$0xff] %v3010_v0   ;;  %v3005_v32 = vpack.c.bf16 %v2296_v8, %v2295_v33 }
 0x209   : > { %v2588_v3 = vadd.f32 %v2587_v24, %v2585_v45  ;;  %v2625_v38 = vrot.slane %v2623_v1, 4  ;;  %3017 = vst [vmem:[%s3984_s23 + $0x30] sm:$0xff] %v3005_v32  }
 0x20b   : > { %v2589_v46 = vrot.slane %v2588_v3, 2  ;;  %v2626_v49 = vadd.f32 %v2625_v38, %v2623_v1 }
 0x20d   : > { %v2590_v63 = vadd.f32 %v2589_v46, %v2588_v3  ;;  %v2627_v51 = vrot.slane %v2626_v49, 2 }
 0x20f   : > { %v2591_v30 = vrot.slane %v2590_v63, 1  ;;  %v2628_v23 = vadd.f32 %v2627_v51, %v2626_v49 }
 0x211   : > { %v2592_v4 = vadd.f32 %v2591_v30, %v2590_v63  ;;  %v2629_v20 = vrot.slane %v2628_v23, 1 }
 0x213   : > { %2593 = vst [vmem:[%s213_s27] sm:$0x1] %v2592_v4  ;;  %v2630_v6 = vadd.f32 %v2629_v20, %v2628_v23 }
 0x215   : > { %2631 = vst [vmem:[%s213_s27 + $0x1] sm:$0x1] %v2630_v6 }
 0x216 PF: > { %s15_s15 = sadd.s32 1, %s3336_s15  }
 0x217   : > { %p12_p5 = scmp.ge.s32.totalorder %s15_s15, 4  }
 0x219   :  { %14 = sbr.rel (!%p12_p5) target bundleno = 1 (0x1), region = 82 }

</bundles_post_ra>
